<compile_context>
chip_gen: v7x
topology: tpu7x:2x2x1
jax: 0.10.0
libtpu: 0.0.40
codegen_flags: <defaults>
</compile_context>

<pallas_src>
import math

import jax
import jax.numpy as jnp
from jax import lax
from jax.experimental import pallas as pl
from jax.experimental.pallas import tpu as pltpu


def _local_alignment_kernel(scale_ref, img_ref, tab_ref,
                            w1_ref, b1_ref, w2_ref, b2_ref,
                            t2i_ref, img_loss_ref, tab_loss_ref):
    f32 = jnp.float32
    in_dtype = img_ref.dtype

    img = img_ref[...]                               # [Bb, S_i, D] (input dtype)
    tab = tab_ref[...]                               # [Bb, S_t, D] (input dtype)
    Bb, S_i, D = img.shape
    S_t = tab.shape[1]
    inv_sqrt_d = 1.0 / math.sqrt(D)

    def softmax_last(x):
        # exact softmax: t2i is an externally consumed embedding, so no
        # approximate reciprocal here.
        m = jnp.max(x, axis=-1, keepdims=True)
        e = jnp.exp(x - m)
        return e / jnp.sum(e, axis=-1, keepdims=True)

    # ---- local cross attention (batched over the Bb block) ----
    s_it = jnp.einsum('bid,btd->bit', img, tab,
                      preferred_element_type=f32) * inv_sqrt_d        # [Bb,S_i,S_t]
    att_i = softmax_last(s_it)                                        # f32
    t2i = jnp.einsum('bit,btd->bid', att_i.astype(in_dtype), tab,
                     preferred_element_type=f32)                      # [Bb,S_i,D] f32

    # s_ti == swapaxes(s_it, 1, 2); recomputed with a second standard-form
    # batched matmul (safe Mosaic lowering, ~1/5 of attention MXU work).
    s_ti = jnp.einsum('btd,bid->bti', tab, img,
                      preferred_element_type=f32) * inv_sqrt_d        # [Bb,S_t,S_i]
    att_t = softmax_last(s_ti)
    i2t = jnp.einsum('bti,bid->btd', att_t.astype(in_dtype), img,
                     preferred_element_type=f32)                      # [Bb,S_t,D] f32

    t2i_ref[...] = t2i.astype(t2i_ref.dtype)

    # ---- SimSiam image loss: one fused predictor pass over [img ; t2i] ----
    w1 = w1_ref[...]
    w2 = w2_ref[...]
    b1 = b1_ref[...].astype(f32)
    b2 = b2_ref[...].astype(f32)

    img2d_f = img.astype(f32).reshape(Bb * S_i, D)
    t2i2d_f = t2i.reshape(Bb * S_i, D)
    x2d = jnp.concatenate([img2d_f, t2i2d_f], axis=0)   # predictor inputs [2*Bb*S_i, D]
    z2d = jnp.concatenate([t2i2d_f, img2d_f], axis=0)   # cosine targets (swapped order)

    h2d = jnp.maximum(
        jnp.dot(x2d.astype(w1.dtype), w1, preferred_element_type=f32) + b1, 0.0)
    p2d = jnp.dot(h2d.astype(w2.dtype), w2, preferred_element_type=f32) + b2

    eps = 1e-8
    inv_p = lax.rsqrt(jnp.maximum(jnp.sum(p2d * p2d, -1, keepdims=True), eps * eps))
    inv_z = lax.rsqrt(jnp.maximum(jnp.sum(z2d * z2d, -1, keepdims=True), eps * eps))
    cos = jnp.sum(p2d * z2d, -1, keepdims=True) * inv_p * inv_z       # [2*Bb*S_i, 1]
    cos_x = cos[:Bb * S_i].reshape(Bb, S_i, 1)      # cos(pred(img), t2i)
    cos_y = cos[Bb * S_i:].reshape(Bb, S_i, 1)      # cos(pred(t2i), img)
    image_loss = -0.5 * (jnp.mean(cos_x, axis=1) + jnp.mean(cos_y, axis=1))  # [Bb,1]

    # ---- CLIP-style table loss: logits_per_table == logits_per_image^T, so
    #      one logits matmul + row/column LSE + elementwise diagonal suffices.
    scale = scale_ref[0, 0]

    def l2n(x):
        return x * lax.rsqrt(jnp.maximum(jnp.sum(x * x, -1, keepdims=True), 1e-24))

    a_n = l2n(tab.astype(f32))                                        # embed_A
    b_n = l2n(i2t)                                                    # embed_B
    logits = scale * jnp.einsum('bid,bjd->bij',
                                b_n.astype(in_dtype), a_n.astype(in_dtype),
                                preferred_element_type=f32)           # [Bb,S_t,S_t]
    diag = scale * jnp.sum(b_n * a_n, -1, keepdims=True)              # [Bb,S_t,1]

    def lse(x, axis):
        m = jnp.max(x, axis=axis, keepdims=True)
        return jnp.log(jnp.sum(jnp.exp(x - m), axis=axis, keepdims=True)) + m

    lse_rows = lse(logits, axis=2)     # rows of logits_per_image    [Bb,S_t,1]
    lse_cols = lse(logits, axis=1)     # rows of logits_per_table    [Bb,1,S_t]
    table_loss = (0.5 * (jnp.mean(lse_rows, axis=1) + jnp.mean(lse_cols, axis=2))
                  - jnp.mean(diag, axis=1))                           # [Bb, 1]

    # ---- per-batch-element losses, written lane-dense (no scalar accumulator) ----
    img_loss_ref[0] = jnp.broadcast_to(image_loss, img_loss_ref.shape[1:])
    tab_loss_ref[0] = jnp.broadcast_to(table_loss, tab_loss_ref.shape[1:])


# ---------------- generation-aware tiling helpers ----------------

def _vmem_budget_bytes():
    try:
        return int(pltpu.get_tpu_info().vmem_capacity_bytes)
    except Exception:
        return 64 * 1024 * 1024       # conservative: v7x physical VMEM per TC


def _num_tensorcores():
    try:
        info = pltpu.get_tpu_info()
        for attr in ("num_cores", "tensorcores_per_chip", "num_tensorcores"):
            n = getattr(info, attr, None)
            if n:
                return int(n)
    except Exception:
        pass
    try:
        kind = (getattr(jax.devices()[0], "device_kind", "") or "").lower()
        if ("v4" in kind) or ("v5p" in kind) or ("v7" in kind):
            return 2                  # dual-TensorCore generations
    except Exception:
        pass
    return 1


def _per_sample_vmem_bytes(S_i, S_t, D, H, in_bytes):
    f32 = 4
    # double-buffered pipelined blocks (img in, tab in, t2i out)
    pipelined = 2 * (2 * S_i * D + S_t * D) * in_bytes
    # f32 working set inside the kernel
    work = f32 * (3 * S_i * D + S_t * D                      # img/t2i f32 copies, i2t
                  + 4 * S_i * S_t                            # s_it/att_i/s_ti/att_t
                  + 2 * 2 * S_i * (D + H + D)                # x2d/z2d, h2d, p2d
                  + 2 * S_t * D + S_t * S_t)                 # a_n/b_n, logits
    return pipelined + work


def _pick_block_b(B, per_sample_bytes, data_budget_bytes, num_cores):
    best = 1
    for bb in range(1, B + 1):
        if B % bb:
            continue
        if bb * per_sample_bytes > data_budget_bytes:
            break
        if bb > 1 and (B // bb) < num_cores:
            continue                  # keep every TensorCore fed on dual-TC chips
        best = bb
    return best


# ---------------- wrapper ----------------

def local_alignment_loss(img_stacks, tab_stacks, w1, b1, w2, b2, logit_scale,
                         block_b=None):
    B, S_i, D = img_stacks.shape
    _, S_t, _ = tab_stacks.shape
    H = w1.shape[1]

    vmem_budget = _vmem_budget_bytes()
    num_cores = _num_tensorcores()
    # ~48 MiB on v7x (64 MiB physical), up to ~96 MiB on v5e/v6e (128 MiB).
    vmem_limit = max(32 << 20, min(100 << 20, int(0.75 * vmem_budget)))

    if block_b is None:
        in_bytes = jnp.dtype(img_stacks.dtype).itemsize
        per_sample = _per_sample_vmem_bytes(S_i, S_t, D, H, in_bytes)
        block_b = _pick_block_b(B, per_sample, int(0.6 * vmem_limit), num_cores)
    assert B % block_b == 0
    nb = B // block_b

    scale = jnp.exp(logit_scale).reshape(1, 1).astype(jnp.float32)
    b1_2d = b1.reshape(1, H)
    b2_2d = b2.reshape(1, D)

    out_shapes = (
        jax.ShapeDtypeStruct((B, S_i, D), img_stacks.dtype),     # t2i embed stacks
        jax.ShapeDtypeStruct((nb, block_b, 128), jnp.float32),   # per-sample image losses
        jax.ShapeDtypeStruct((nb, block_b, 128), jnp.float32),   # per-sample table losses
    )

    grid_spec = pltpu.PrefetchScalarGridSpec(
        num_scalar_prefetch=0,
        grid=(nb,),
        in_specs=[
            pl.BlockSpec(memory_space=pltpu.MemorySpace.SMEM),      # exp(logit_scale)
            pl.BlockSpec((block_b, S_i, D), lambda b: (b, 0, 0)),   # image embeds
            pl.BlockSpec((block_b, S_t, D), lambda b: (b, 0, 0)),   # table embeds
            pl.BlockSpec((D, H), lambda b: (0, 0)),                 # predictor W1
            pl.BlockSpec((1, H), lambda b: (0, 0)),                 # predictor b1
            pl.BlockSpec((H, D), lambda b: (0, 0)),                 # predictor W2
            pl.BlockSpec((1, D), lambda b: (0, 0)),                 # predictor b2
        ],
        out_specs=[
            pl.BlockSpec((block_b, S_i, D), lambda b: (b, 0, 0)),
            pl.BlockSpec((1, block_b, 128), lambda b: (b, 0, 0)),
            pl.BlockSpec((1, block_b, 128), lambda b: (b, 0, 0)),
        ],
    )

    in_bytes = jnp.dtype(img_stacks.dtype).itemsize
    flops = 2 * B * (4 * S_i * S_t * D + 2 * S_i * (D * H + H * D) + S_t * S_t * D)
    transcendentals = B * (2 * S_i * S_t + 2 * S_t * S_t + 4 * S_i + 3 * S_t)
    bytes_accessed = (in_bytes * B * (2 * S_i * D + S_t * D)
                      + 4 * (int(w1.size) + int(b1.size) + int(w2.size) + int(b2.size))
                      + 4 * 2 * B * 128)
    cost = pl.CostEstimate(flops=int(flops),
                           transcendentals=int(transcendentals),
                           bytes_accessed=int(bytes_accessed))

    t2i_stacks, img_losses, tab_losses = pl.pallas_call(
        _local_alignment_kernel,
        out_shape=out_shapes,
        grid_spec=grid_spec,
        cost_estimate=cost,
        compiler_params=pltpu.CompilerParams(
            dimension_semantics=("parallel",),
            vmem_limit_bytes=vmem_limit),
    )(scale, img_stacks, tab_stacks, w1, b1_2d, w2, b2_2d)

    image_loss = jnp.mean(img_losses[:, :, 0])
    table_loss = jnp.mean(tab_losses[:, :, 0])
    return image_loss, table_loss, t2i_stacks


def _reference(img, tab, w1, b1, w2, b2, logit_scale):
    """Pure-JAX mirror of the PyTorch forward, for correctness checking."""
    def per_sample(img_s, tab_s):
        d = img_s.shape[-1]
        att_i = jax.nn.softmax(img_s @ tab_s.T / jnp.sqrt(jnp.float32(d)), axis=-1)
        t2i = att_i @ tab_s
        att_t = jax.nn.softmax(tab_s @ img_s.T / jnp.sqrt(jnp.float32(d)), axis=-1)
        i2t = att_t @ img_s

        def pred(x):
            return jnp.maximum(x @ w1 + b1, 0.0) @ w2 + b2

        def cosm(a, c):
            na = jnp.maximum(jnp.linalg.norm(a, axis=-1), 1e-8)
            nc = jnp.maximum(jnp.linalg.norm(c, axis=-1), 1e-8)
            return jnp.mean(jnp.sum(a * c, -1) / (na * nc))

        image_loss = -(cosm(pred(img_s), t2i) + cosm(pred(t2i), img_s)) * 0.5

        scale = jnp.exp(logit_scale)

        def l2n(x):
            return x / jnp.maximum(jnp.linalg.norm(x, axis=-1, keepdims=True), 1e-12)

        A = l2n(tab_s)
        Bn = l2n(i2t)
        li = scale * Bn @ A.T
        lt = scale * A @ Bn.T
        labels = jnp.arange(tab_s.shape[0])

        def ce(logits):
            return jnp.mean(jax.nn.logsumexp(logits, -1)
                            - logits[jnp.arange(logits.shape[0]), labels])

        table_loss = (ce(li) + ce(lt)) * 0.5
        return image_loss, table_loss, t2i

    il, tl, t2i = jax.vmap(per_sample)(img, tab)
    return jnp.mean(il), jnp.mean(tl), t2i


if __name__ == "__main__":
    B, S_i, S_t, D, H = 2, 16, 8, 32, 32   # batch, image tokens, table tokens, dim, hidden

    key = jax.random.PRNGKey(0)
    k1, k2, k3, k4, k5, k6 = jax.random.split(key, 6)
    img = jax.random.normal(k1, (B, S_i, D), jnp.float32)
    tab = jax.random.normal(k2, (B, S_t, D), jnp.float32)
    w1 = jax.random.normal(k3, (D, H), jnp.float32) * 0.1
    b1 = jax.random.normal(k4, (H,), jnp.float32) * 0.01
    w2 = jax.random.normal(k5, (H, D), jnp.float32) * 0.1
    b2 = jax.random.normal(k6, (D,), jnp.float32) * 0.01
    logit_scale = jnp.float32(math.log(1.0 / 0.07))   # nn.Parameter(ones([]) * logit_scale)

    image_loss, table_loss, t2i_stacks = local_alignment_loss(
        img, tab, w1, b1, w2, b2, logit_scale)
    jax.block_until_ready((image_loss, table_loss, t2i_stacks))

    ref_img_loss, ref_tab_loss, ref_t2i = _reference(img, tab, w1, b1, w2, b2, logit_scale)
    # Losses are means -> tight tolerance; t2i gets a slightly looser bound to
    # absorb MXU f32 matmul pass-count differences vs XLA's default precision.
    assert jnp.allclose(image_loss, ref_img_loss, rtol=2e-3, atol=2e-3), (image_loss, ref_img_loss)
    assert jnp.allclose(table_loss, ref_tab_loss, rtol=2e-3, atol=2e-3), (table_loss, ref_tab_loss)
    assert jnp.allclose(t2i_stacks, ref_t2i, rtol=5e-3, atol=5e-3)

    print("KERNEL_OK")
</pallas_src>

<mosaic_0001>
module attributes {stable_mosaic.version = 11 : i64} {
  func.func @_local_alignment_kernel(%arg0: i32, %arg1: memref<1x1xf32, #tpu.memory_space<smem>>, %arg2: memref<2x16x32xf32, #tpu.memory_space<vmem>>, %arg3: memref<2x8x32xf32, #tpu.memory_space<vmem>>, %arg4: memref<32x32xf32, #tpu.memory_space<vmem>>, %arg5: memref<1x32xf32, #tpu.memory_space<vmem>>, %arg6: memref<32x32xf32, #tpu.memory_space<vmem>>, %arg7: memref<1x32xf32, #tpu.memory_space<vmem>>, %arg8: memref<2x16x32xf32, #tpu.memory_space<vmem>>, %arg9: memref<1x2x128xf32, #tpu.memory_space<vmem>>, %arg10: memref<1x2x128xf32, #tpu.memory_space<vmem>>) attributes {dimension_semantics = [#tpu.dimension_semantics<parallel>], iteration_bounds = array<i64: 1>, scalar_prefetch = 0 : i64, scratch_operands = 0 : i64, tpu.core_type = #tpu.core_type<tc>, window_params = [{transform_indices = @transform_0, window_bounds = array<i64: 1, 1>}, {transform_indices = @transform_1, window_bounds = array<i64: 2, 16, 32>}, {transform_indices = @transform_2, window_bounds = array<i64: 2, 8, 32>}, {pipeline_mode = #tpu.pipeline_mode<synchronous>, transform_indices = @transform_3, window_bounds = array<i64: 32, 32>}, {pipeline_mode = #tpu.pipeline_mode<synchronous>, transform_indices = @transform_4, window_bounds = array<i64: 1, 32>}, {pipeline_mode = #tpu.pipeline_mode<synchronous>, transform_indices = @transform_5, window_bounds = array<i64: 32, 32>}, {pipeline_mode = #tpu.pipeline_mode<synchronous>, transform_indices = @transform_6, window_bounds = array<i64: 1, 32>}, {transform_indices = @transform_7, window_bounds = array<i64: 2, 16, 32>}, {transform_indices = @transform_8, window_bounds = array<i64: 1, 2, 128>}, {transform_indices = @transform_9, window_bounds = array<i64: 1, 2, 128>}]} {
    %c0 = arith.constant 0 : index
    %c0_0 = arith.constant 0 : index
    %c0_1 = arith.constant 0 : index
    %0 = vector.load %arg2[%c0, %c0_0, %c0_1] : memref<2x16x32xf32, #tpu.memory_space<vmem>>, vector<2x16x32xf32>
    %c0_2 = arith.constant 0 : index
    %c0_3 = arith.constant 0 : index
    %c0_4 = arith.constant 0 : index
    %1 = vector.load %arg3[%c0_2, %c0_3, %c0_4] : memref<2x8x32xf32, #tpu.memory_space<vmem>>, vector<2x8x32xf32>
    "tpu.trace_start"() <{level = 10 : i32, message = "bid,btd->bit"}> : () -> ()
    %cst = arith.constant dense<0.000000e+00> : vector<2x16x8xf32>
    %2 = tpu.matmul %0, %1, %cst {dimension_numbers = #tpu.dot_dimension_numbers<[2], [2], [1], [1], [0, 0, 0, 1, 1, 1], [0], [0]>} : vector<2x16x32xf32>, vector<2x8x32xf32>, vector<2x16x8xf32> -> vector<2x16x8xf32>
    "tpu.trace_stop"() : () -> ()
    %cst_5 = arith.constant 0.176776692 : f32
    %3 = vector.broadcast %cst_5 : f32 to vector<2x16x8xf32>
    %4 = arith.mulf %2, %3 : vector<2x16x8xf32>
    %cst_6 = arith.constant dense<0xFF800000> : vector<2x16xf32>
    %5 = vector.multi_reduction <maximumf>, %4, %cst_6 [2] : vector<2x16x8xf32> to vector<2x16xf32>
    %6 = vector.shape_cast %5 : vector<2x16xf32> to vector<2x16x1xf32>
    %7 = vector.broadcast %6 : vector<2x16x1xf32> to vector<2x16x8xf32>
    %8 = arith.subf %4, %7 : vector<2x16x8xf32>
    %9 = math.exp %8 : vector<2x16x8xf32>
    %cst_7 = arith.constant dense<0.000000e+00> : vector<2x16xf32>
    %10 = vector.multi_reduction <add>, %9, %cst_7 [2] : vector<2x16x8xf32> to vector<2x16xf32>
    %11 = vector.shape_cast %10 : vector<2x16xf32> to vector<2x16x1xf32>
    %12 = vector.broadcast %11 : vector<2x16x1xf32> to vector<2x16x8xf32>
    %13 = arith.divf %9, %12 : vector<2x16x8xf32>
    "tpu.trace_start"() <{level = 10 : i32, message = "bit,btd->bid"}> : () -> ()
    %cst_8 = arith.constant dense<0.000000e+00> : vector<2x16x32xf32>
    %14 = tpu.matmul %13, %1, %cst_8 {dimension_numbers = #tpu.dot_dimension_numbers<[2], [1], [1], [2], [0, 0, 0, 1, 1, 2], [0], [0]>} : vector<2x16x8xf32>, vector<2x8x32xf32>, vector<2x16x32xf32> -> vector<2x16x32xf32>
    "tpu.trace_stop"() : () -> ()
    "tpu.trace_start"() <{level = 10 : i32, message = "btd,bid->bti"}> : () -> ()
    %cst_9 = arith.constant dense<0.000000e+00> : vector<2x8x16xf32>
    %15 = tpu.matmul %1, %0, %cst_9 {dimension_numbers = #tpu.dot_dimension_numbers<[2], [2], [1], [1], [0, 0, 0, 1, 1, 1], [0], [0]>} : vector<2x8x32xf32>, vector<2x16x32xf32>, vector<2x8x16xf32> -> vector<2x8x16xf32>
    "tpu.trace_stop"() : () -> ()
    %cst_10 = arith.constant 0.176776692 : f32
    %16 = vector.broadcast %cst_10 : f32 to vector<2x8x16xf32>
    %17 = arith.mulf %15, %16 : vector<2x8x16xf32>
    %cst_11 = arith.constant dense<0xFF800000> : vector<2x8xf32>
    %18 = vector.multi_reduction <maximumf>, %17, %cst_11 [2] : vector<2x8x16xf32> to vector<2x8xf32>
    %19 = vector.shape_cast %18 : vector<2x8xf32> to vector<2x8x1xf32>
    %20 = vector.broadcast %19 : vector<2x8x1xf32> to vector<2x8x16xf32>
    %21 = arith.subf %17, %20 : vector<2x8x16xf32>
    %22 = math.exp %21 : vector<2x8x16xf32>
    %cst_12 = arith.constant dense<0.000000e+00> : vector<2x8xf32>
    %23 = vector.multi_reduction <add>, %22, %cst_12 [2] : vector<2x8x16xf32> to vector<2x8xf32>
    %24 = vector.shape_cast %23 : vector<2x8xf32> to vector<2x8x1xf32>
    %25 = vector.broadcast %24 : vector<2x8x1xf32> to vector<2x8x16xf32>
    %26 = arith.divf %22, %25 : vector<2x8x16xf32>
    "tpu.trace_start"() <{level = 10 : i32, message = "bti,bid->btd"}> : () -> ()
    %cst_13 = arith.constant dense<0.000000e+00> : vector<2x8x32xf32>
    %27 = tpu.matmul %26, %0, %cst_13 {dimension_numbers = #tpu.dot_dimension_numbers<[2], [1], [1], [2], [0, 0, 0, 1, 1, 2], [0], [0]>} : vector<2x8x16xf32>, vector<2x16x32xf32>, vector<2x8x32xf32> -> vector<2x8x32xf32>
    "tpu.trace_stop"() : () -> ()
    %c0_14 = arith.constant 0 : index
    %c0_15 = arith.constant 0 : index
    %c0_16 = arith.constant 0 : index
    %28 = vector.load %arg8[%c0_14, %c0_15, %c0_16] : memref<2x16x32xf32, #tpu.memory_space<vmem>>, vector<2x16x32xf32>
    tpu.vector_store %arg8[%c0_14, %c0_15, %c0_16], %14 {strides = array<i32>} : memref<2x16x32xf32, #tpu.memory_space<vmem>>, vector<2x16x32xf32>,
    %c0_17 = arith.constant 0 : index
    %c0_18 = arith.constant 0 : index
    %29 = vector.load %arg4[%c0_17, %c0_18] : memref<32x32xf32, #tpu.memory_space<vmem>>, vector<32x32xf32>
    %c0_19 = arith.constant 0 : index
    %c0_20 = arith.constant 0 : index
    %30 = vector.load %arg6[%c0_19, %c0_20] : memref<32x32xf32, #tpu.memory_space<vmem>>, vector<32x32xf32>
    %c0_21 = arith.constant 0 : index
    %c0_22 = arith.constant 0 : index
    %31 = vector.load %arg5[%c0_21, %c0_22] : memref<1x32xf32, #tpu.memory_space<vmem>>, vector<1x32xf32>
    %c0_23 = arith.constant 0 : index
    %c0_24 = arith.constant 0 : index
    %32 = vector.load %arg7[%c0_23, %c0_24] : memref<1x32xf32, #tpu.memory_space<vmem>>, vector<1x32xf32>
    %33 = vector.shape_cast %0 : vector<2x16x32xf32> to vector<32x32xf32>
    %34 = vector.shape_cast %14 : vector<2x16x32xf32> to vector<32x32xf32>
    %35 = tpu.concatenate %33, %34 in 0 : vector<32x32xf32>, vector<32x32xf32> -> vector<64x32xf32>
    %36 = tpu.concatenate %34, %33 in 0 : vector<32x32xf32>, vector<32x32xf32> -> vector<64x32xf32>
    %cst_25 = arith.constant dense<0.000000e+00> : vector<64x32xf32>
    %37 = tpu.matmul %35, %29, %cst_25 {dimension_numbers = #tpu.dot_dimension_numbers<[1], [0], [0], [1], [0, 0, 1, 1], [], []>} : vector<64x32xf32>, vector<32x32xf32>, vector<64x32xf32> -> vector<64x32xf32>
    %38 = vector.broadcast %31 : vector<1x32xf32> to vector<64x32xf32>
    %39 = arith.addf %37, %38 : vector<64x32xf32>
    %cst_26 = arith.constant 0.000000e+00 : f32
    %40 = vector.broadcast %cst_26 : f32 to vector<64x32xf32>
    %41 = arith.maximumf %39, %40 : vector<64x32xf32>
    %cst_27 = arith.constant dense<0.000000e+00> : vector<64x32xf32>
    %42 = tpu.matmul %41, %30, %cst_27 {dimension_numbers = #tpu.dot_dimension_numbers<[1], [0], [0], [1], [0, 0, 1, 1], [], []>} : vector<64x32xf32>, vector<32x32xf32>, vector<64x32xf32> -> vector<64x32xf32>
    %43 = vector.broadcast %32 : vector<1x32xf32> to vector<64x32xf32>
    %44 = arith.addf %42, %43 : vector<64x32xf32>
    %45 = arith.mulf %44, %44 : vector<64x32xf32>
    %cst_28 = arith.constant dense<0.000000e+00> : vector<64xf32>
    %46 = vector.multi_reduction <add>, %45, %cst_28 [1] : vector<64x32xf32> to vector<64xf32>
    %47 = vector.shape_cast %46 : vector<64xf32> to vector<64x1xf32>
    %cst_29 = arith.constant 1.000000e-16 : f32
    %48 = vector.broadcast %cst_29 : f32 to vector<64x1xf32>
    %49 = arith.maximumf %47, %48 : vector<64x1xf32>
    %50 = math.rsqrt %49 : vector<64x1xf32>
    %51 = arith.mulf %36, %36 : vector<64x32xf32>
    %cst_30 = arith.constant dense<0.000000e+00> : vector<64xf32>
    %52 = vector.multi_reduction <add>, %51, %cst_30 [1] : vector<64x32xf32> to vector<64xf32>
    %53 = vector.shape_cast %52 : vector<64xf32> to vector<64x1xf32>
    %cst_31 = arith.constant 1.000000e-16 : f32
    %54 = vector.broadcast %cst_31 : f32 to vector<64x1xf32>
    %55 = arith.maximumf %53, %54 : vector<64x1xf32>
    %56 = math.rsqrt %55 : vector<64x1xf32>
    %57 = arith.mulf %44, %36 : vector<64x32xf32>
    %cst_32 = arith.constant dense<0.000000e+00> : vector<64xf32>
    %58 = vector.multi_reduction <add>, %57, %cst_32 [1] : vector<64x32xf32> to vector<64xf32>
    %59 = vector.shape_cast %58 : vector<64xf32> to vector<64x1xf32>
    %60 = arith.mulf %59, %50 : vector<64x1xf32>
    %61 = arith.mulf %60, %56 : vector<64x1xf32>
    %62 = vector.extract_strided_slice %61 {offsets = [0, 0], sizes = [32, 1], strides = [1, 1]} : vector<64x1xf32> to vector<32x1xf32>
    %63 = vector.shape_cast %62 : vector<32x1xf32> to vector<2x16x1xf32>
    %64 = vector.extract_strided_slice %61 {offsets = [32, 0], sizes = [32, 1], strides = [1, 1]} : vector<64x1xf32> to vector<32x1xf32>
    %65 = vector.shape_cast %64 : vector<32x1xf32> to vector<2x16x1xf32>
    %cst_33 = arith.constant dense<0.000000e+00> : vector<2x1xf32>
    %66 = vector.multi_reduction <add>, %63, %cst_33 [1] : vector<2x16x1xf32> to vector<2x1xf32>
    %cst_34 = arith.constant 1.600000e+01 : f32
    %67 = vector.broadcast %cst_34 : f32 to vector<2x1xf32>
    %68 = arith.divf %66, %67 : vector<2x1xf32>
    %cst_35 = arith.constant dense<0.000000e+00> : vector<2x1xf32>
    %69 = vector.multi_reduction <add>, %65, %cst_35 [1] : vector<2x16x1xf32> to vector<2x1xf32>
    %cst_36 = arith.constant 1.600000e+01 : f32
    %70 = vector.broadcast %cst_36 : f32 to vector<2x1xf32>
    %71 = arith.divf %69, %70 : vector<2x1xf32>
    %72 = arith.addf %68, %71 : vector<2x1xf32>
    %cst_37 = arith.constant -5.000000e-01 : f32
    %73 = vector.broadcast %cst_37 : f32 to vector<2x1xf32>
    %74 = arith.mulf %73, %72 : vector<2x1xf32>
    %c0_38 = arith.constant 0 : index
    %c0_39 = arith.constant 0 : index
    %75 = memref.load %arg1[%c0_38, %c0_39] : memref<1x1xf32, #tpu.memory_space<smem>>
    %76 = arith.mulf %1, %1 : vector<2x8x32xf32>
    %cst_40 = arith.constant dense<0.000000e+00> : vector<2x8xf32>
    %77 = vector.multi_reduction <add>, %76, %cst_40 [2] : vector<2x8x32xf32> to vector<2x8xf32>
    %78 = vector.shape_cast %77 : vector<2x8xf32> to vector<2x8x1xf32>
    %cst_41 = arith.constant 1.000000e-24 : f32
    %79 = vector.broadcast %cst_41 : f32 to vector<2x8x1xf32>
    %80 = arith.maximumf %78, %79 : vector<2x8x1xf32>
    %81 = math.rsqrt %80 : vector<2x8x1xf32>
    %82 = vector.broadcast %81 : vector<2x8x1xf32> to vector<2x8x32xf32>
    %83 = arith.mulf %1, %82 : vector<2x8x32xf32>
    %84 = arith.mulf %27, %27 : vector<2x8x32xf32>
    %cst_42 = arith.constant dense<0.000000e+00> : vector<2x8xf32>
    %85 = vector.multi_reduction <add>, %84, %cst_42 [2] : vector<2x8x32xf32> to vector<2x8xf32>
    %86 = vector.shape_cast %85 : vector<2x8xf32> to vector<2x8x1xf32>
    %cst_43 = arith.constant 1.000000e-24 : f32
    %87 = vector.broadcast %cst_43 : f32 to vector<2x8x1xf32>
    %88 = arith.maximumf %86, %87 : vector<2x8x1xf32>
    %89 = math.rsqrt %88 : vector<2x8x1xf32>
    %90 = vector.broadcast %89 : vector<2x8x1xf32> to vector<2x8x32xf32>
    %91 = arith.mulf %27, %90 : vector<2x8x32xf32>
    "tpu.trace_start"() <{level = 10 : i32, message = "bid,bjd->bij"}> : () -> ()
    %cst_44 = arith.constant dense<0.000000e+00> : vector<2x8x8xf32>
    %92 = tpu.matmul %91, %83, %cst_44 {dimension_numbers = #tpu.dot_dimension_numbers<[2], [2], [1], [1], [0, 0, 0, 1, 1, 1], [0], [0]>} : vector<2x8x32xf32>, vector<2x8x32xf32>, vector<2x8x8xf32> -> vector<2x8x8xf32>
    "tpu.trace_stop"() : () -> ()
    %93 = vector.broadcast %75 : f32 to vector<2x8x8xf32>
    %94 = arith.mulf %93, %92 : vector<2x8x8xf32>
    %95 = arith.mulf %91, %83 : vector<2x8x32xf32>
    %cst_45 = arith.constant dense<0.000000e+00> : vector<2x8xf32>
    %96 = vector.multi_reduction <add>, %95, %cst_45 [2] : vector<2x8x32xf32> to vector<2x8xf32>
    %97 = vector.shape_cast %96 : vector<2x8xf32> to vector<2x8x1xf32>
    %98 = vector.broadcast %75 : f32 to vector<2x8x1xf32>
    %99 = arith.mulf %98, %97 : vector<2x8x1xf32>
    %cst_46 = arith.constant dense<0xFF800000> : vector<2x8xf32>
    %100 = vector.multi_reduction <maximumf>, %94, %cst_46 [2] : vector<2x8x8xf32> to vector<2x8xf32>
    %101 = vector.shape_cast %100 : vector<2x8xf32> to vector<2x8x1xf32>
    %102 = vector.broadcast %101 : vector<2x8x1xf32> to vector<2x8x8xf32>
    %103 = arith.subf %94, %102 : vector<2x8x8xf32>
    %104 = math.exp %103 : vector<2x8x8xf32>
    %cst_47 = arith.constant dense<0.000000e+00> : vector<2x8xf32>
    %105 = vector.multi_reduction <add>, %104, %cst_47 [2] : vector<2x8x8xf32> to vector<2x8xf32>
    %106 = vector.shape_cast %105 : vector<2x8xf32> to vector<2x8x1xf32>
    %107 = math.log %106 : vector<2x8x1xf32>
    %108 = arith.addf %107, %101 : vector<2x8x1xf32>
    %cst_48 = arith.constant dense<0xFF800000> : vector<2x8xf32>
    %109 = vector.multi_reduction <maximumf>, %94, %cst_48 [1] : vector<2x8x8xf32> to vector<2x8xf32>
    %110 = vector.shape_cast %109 : vector<2x8xf32> to vector<2x1x8xf32>
    %111 = vector.broadcast %110 : vector<2x1x8xf32> to vector<2x8x8xf32>
    %112 = arith.subf %94, %111 : vector<2x8x8xf32>
    %113 = math.exp %112 : vector<2x8x8xf32>
    %cst_49 = arith.constant dense<0.000000e+00> : vector<2x8xf32>
    %114 = vector.multi_reduction <add>, %113, %cst_49 [1] : vector<2x8x8xf32> to vector<2x8xf32>
    %115 = vector.shape_cast %114 : vector<2x8xf32> to vector<2x1x8xf32>
    %116 = math.log %115 : vector<2x1x8xf32>
    %117 = arith.addf %116, %110 : vector<2x1x8xf32>
    %cst_50 = arith.constant dense<0.000000e+00> : vector<2x1xf32>
    %118 = vector.multi_reduction <add>, %108, %cst_50 [1] : vector<2x8x1xf32> to vector<2x1xf32>
    %cst_51 = arith.constant 8.000000e+00 : f32
    %119 = vector.broadcast %cst_51 : f32 to vector<2x1xf32>
    %120 = arith.divf %118, %119 : vector<2x1xf32>
    %cst_52 = arith.constant dense<0.000000e+00> : vector<2x1xf32>
    %121 = vector.multi_reduction <add>, %117, %cst_52 [2] : vector<2x1x8xf32> to vector<2x1xf32>
    %cst_53 = arith.constant 8.000000e+00 : f32
    %122 = vector.broadcast %cst_53 : f32 to vector<2x1xf32>
    %123 = arith.divf %121, %122 : vector<2x1xf32>
    %124 = arith.addf %120, %123 : vector<2x1xf32>
    %cst_54 = arith.constant 5.000000e-01 : f32
    %125 = vector.broadcast %cst_54 : f32 to vector<2x1xf32>
    %126 = arith.mulf %125, %124 : vector<2x1xf32>
    %cst_55 = arith.constant dense<0.000000e+00> : vector<2x1xf32>
    %127 = vector.multi_reduction <add>, %99, %cst_55 [1] : vector<2x8x1xf32> to vector<2x1xf32>
    %cst_56 = arith.constant 8.000000e+00 : f32
    %128 = vector.broadcast %cst_56 : f32 to vector<2x1xf32>
    %129 = arith.divf %127, %128 : vector<2x1xf32>
    %130 = arith.subf %126, %129 : vector<2x1xf32>
    %131 = vector.shape_cast %74 : vector<2x1xf32> to vector<2x1xf32>
    %132 = vector.broadcast %131 : vector<2x1xf32> to vector<2x128xf32>
    %c0_57 = arith.constant 0 : index
    %c0_58 = arith.constant 0 : index
    %c0_59 = arith.constant 0 : index
    %133 = vector.load %arg9[%c0_57, %c0_58, %c0_59] : memref<1x2x128xf32, #tpu.memory_space<vmem>>, vector<1x2x128xf32>
    %134 = vector.shape_cast %133 : vector<1x2x128xf32> to vector<2x128xf32>
    %135 = vector.shape_cast %132 : vector<2x128xf32> to vector<1x2x128xf32>
    tpu.vector_store %arg9[%c0_57, %c0_58, %c0_59], %135 {strides = array<i32>} : memref<1x2x128xf32, #tpu.memory_space<vmem>>, vector<1x2x128xf32>,
    %136 = vector.shape_cast %130 : vector<2x1xf32> to vector<2x1xf32>
    %137 = vector.broadcast %136 : vector<2x1xf32> to vector<2x128xf32>
    %c0_60 = arith.constant 0 : index
    %c0_61 = arith.constant 0 : index
    %c0_62 = arith.constant 0 : index
    %138 = vector.load %arg10[%c0_60, %c0_61, %c0_62] : memref<1x2x128xf32, #tpu.memory_space<vmem>>, vector<1x2x128xf32>
    %139 = vector.shape_cast %138 : vector<1x2x128xf32> to vector<2x128xf32>
    %140 = vector.shape_cast %137 : vector<2x128xf32> to vector<1x2x128xf32>
    tpu.vector_store %arg10[%c0_60, %c0_61, %c0_62], %140 {strides = array<i32>} : memref<1x2x128xf32, #tpu.memory_space<vmem>>, vector<1x2x128xf32>,
    return
  }
  func.func @transform_0(%arg0: i32) -> (i32, i32) {
    %c0_i32 = arith.constant 0 : i32
    %c0_i32_0 = arith.constant 0 : i32
    %c0_i32_1 = arith.constant 0 : i32
    return %c0_i32, %c0_i32_0 : i32, i32
  }
  func.func @transform_1(%arg0: i32) -> (i32, i32, i32) {
    %c0_i32 = arith.constant 0 : i32
    %c0_i32_0 = arith.constant 0 : i32
    %c0_i32_1 = arith.constant 0 : i32
    return %arg0, %c0_i32, %c0_i32_0 : i32, i32, i32
  }
  func.func @transform_2(%arg0: i32) -> (i32, i32, i32) {
    %c0_i32 = arith.constant 0 : i32
    %c0_i32_0 = arith.constant 0 : i32
    %c0_i32_1 = arith.constant 0 : i32
    return %arg0, %c0_i32, %c0_i32_0 : i32, i32, i32
  }
  func.func @transform_3(%arg0: i32) -> (i32, i32) {
    %c0_i32 = arith.constant 0 : i32
    %c0_i32_0 = arith.constant 0 : i32
    %c0_i32_1 = arith.constant 0 : i32
    return %c0_i32, %c0_i32_0 : i32, i32
  }
  func.func @transform_4(%arg0: i32) -> (i32, i32) {
    %c0_i32 = arith.constant 0 : i32
    %c0_i32_0 = arith.constant 0 : i32
    %c0_i32_1 = arith.constant 0 : i32
    return %c0_i32, %c0_i32_0 : i32, i32
  }
  func.func @transform_5(%arg0: i32) -> (i32, i32) {
    %c0_i32 = arith.constant 0 : i32
    %c0_i32_0 = arith.constant 0 : i32
    %c0_i32_1 = arith.constant 0 : i32
    return %c0_i32, %c0_i32_0 : i32, i32
  }
  func.func @transform_6(%arg0: i32) -> (i32, i32) {
    %c0_i32 = arith.constant 0 : i32
    %c0_i32_0 = arith.constant 0 : i32
    %c0_i32_1 = arith.constant 0 : i32
    return %c0_i32, %c0_i32_0 : i32, i32
  }
  func.func @transform_7(%arg0: i32) -> (i32, i32, i32) {
    %c0_i32 = arith.constant 0 : i32
    %c0_i32_0 = arith.constant 0 : i32
    %c0_i32_1 = arith.constant 0 : i32
    return %arg0, %c0_i32, %c0_i32_0 : i32, i32, i32
  }
  func.func @transform_8(%arg0: i32) -> (i32, i32, i32) {
    %c0_i32 = arith.constant 0 : i32
    %c0_i32_0 = arith.constant 0 : i32
    %c0_i32_1 = arith.constant 0 : i32
    return %arg0, %c0_i32, %c0_i32_0 : i32, i32, i32
  }
  func.func @transform_9(%arg0: i32) -> (i32, i32, i32) {
    %c0_i32 = arith.constant 0 : i32
    %c0_i32_0 = arith.constant 0 : i32
    %c0_i32_1 = arith.constant 0 : i32
    return %arg0, %c0_i32, %c0_i32_0 : i32, i32, i32
  }
}

</mosaic_0001>

<bundles_post_ra>
// kernel: tpu_custom_call.1
= control target key start
LH: loop header
LB: loop body
LE: loop exit
PB: predicated region body
PF: predicated region fallthrough
CT: control target
= control target key end

     0   :  { %16 = vsyncpa [#allocation4], 0  ;;  %s2542_s0 = inlined_call_operand.<no memory space> [shape: f32[1,1], index: 0, kind: input, shape index: {}]   ;;  %s2543_s1 = inlined_call_operand.hbm [shape: f32[2,16,32], index: 1, kind: input, shape index: {}]   ;;  %s2544_s2 = inlined_call_operand.hbm [shape: f32[2,8,32], index: 2, kind: input, shape index: {}]   ;;  %s2545_s3 = inlined_call_operand.hbm [shape: f32[32,32], index: 3, kind: input, shape index: {}]   ;;  %s2546_s4 = inlined_call_operand.vmem [shape: f32[1,32], index: 4, kind: input, shape index: {}]   ;;  %s2547_s5 = inlined_call_operand.hbm [shape: f32[32,32], index: 5, kind: input, shape index: {}]   ;;  %s2548_s6 = inlined_call_operand.vmem [shape: f32[1,32], index: 6, kind: input, shape index: {}]   ;;  %s2549_s7 = inlined_call_operand.hbm [shape: f32[2,16,32], index: 7, kind: output, shape index: {0}]   ;;  %s2550_s8 = inlined_call_operand.hbm [shape: f32[1,2,128], index: 8, kind: output, shape index: {1}]   ;;  %s2551_s9 = inlined_call_operand.hbm [shape: f32[1,2,128], index: 9, kind: output, shape index: {2}]  }
   0x1   :  { %17 = vsyncpa [#allocation7], 0 }
   0x2   :  { %18 = vsyncpa [#allocation10], 0 }
   0x3   :  { %19 = vsyncpa [#allocation5], 0 }
   0x4   :  { %20 = vsyncpa [#allocation13], 0  ;;  %s2077_s30 = smov [#allocation6]   ;;  %s2078_s11 = smov [#allocation3]  }
   0x5   :  { %s40_s10 = sshll.u32 %s2077_s30, 4  ;;  %s28_s12 = sshll.u32 %s2078_s11, 4  ;;  %s41_s10 = int_to_ptr.vmem [resolvable:$true] %s40_s10  ;;  %s2139_s12 = int_to_ptr.vmem [resolvable:$true] %s28_s12 }
   0x6   :  { %s1913_s15 = scalar_lea.hbm %s2544_s2, 256 }
   0x7   :  { %p1914_p0 = scmp.ne.s32.totalorder %s2544_s2, %s1913_s15  ;;  %p1917_p1 = scmp.lt.u32.totalorder %s1913_s15, %s2544_s2 }
   0x9   :  { %p1919_p2 = pnand %p1917_p1, %p1914_p0 }
   0xb   :  { %1922 = shalt.err (!%p1919_p2)
}
   0xc   :  { %s1923_s20 = scalar_lea.vmem %s41_s10, 256  ;;  %p1928_p4 = scmp.lt.s32.totalorder %s41_s10, %s41_s10 }
   0xd   :  { %p1924_p3 = scmp.ne.s32.totalorder %s41_s10, %s1923_s20  ;;  %p1929_p5 = scmp.lt.s32.totalorder %s1923_s20, %s1923_s20 }
   0xf   :  { %p1930_p6 = por %p1929_p5, %p1928_p4 }
  0x11   :  { %p1931_p7 = pnand %p1930_p6, %p1924_p3 }
  0x13   :  { %1934 = shalt.err (!%p1931_p7)
}
  0x14   :  { %s2079_s21 = smov 128   ;;  %s2080_s22 = smov 8  }
  0x15   :  { %46 = dma.hbm_to_vmem [thread:$0]  %s2544_s2, 256, %s41_s10, [#allocation7], %s2079_s21, %s2079_s21, %s2080_s22  }
  0x16   :  { %s1935_s27 = scalar_lea.hbm %s2543_s1, 512 }
  0x17   :  { %p1936_p8 = scmp.ne.s32.totalorder %s2543_s1, %s1935_s27  ;;  %p1939_p9 = scmp.lt.u32.totalorder %s1935_s27, %s2543_s1 }
  0x19   :  { %p1941_p10 = pnand %p1939_p9, %p1936_p8 }
  0x1b   :  { %1944 = shalt.err (!%p1941_p10)
}
  0x1c   :  { %s1945_s13 = scalar_lea.vmem %s2139_s12, 512  ;;  %p1950_p12 = scmp.lt.s32.totalorder %s2139_s12, %s2139_s12 }
  0x1d   :  { %p1946_p11 = scmp.ne.s32.totalorder %s2139_s12, %s1945_s13  ;;  %p1951_p13 = scmp.lt.s32.totalorder %s1945_s13, %s1945_s13 }
  0x1f   :  { %p1952_p0 = por %p1951_p13, %p1950_p12 }
  0x21   :  { %p1953_p1 = pnand %p1952_p0, %p1946_p11 }
  0x23   :  { %1956 = shalt.err (!%p1953_p1)
}
  0x24   :  { %34 = dma.hbm_to_vmem [thread:$0]  %s2543_s1, 512, %s2139_s12, [#allocation4], %s2079_s21, %s2079_s21, %s2080_s22  }
  0x25   :  { %s2081_s14 = smov [#allocation8]   ;;  %s2082_s16 = smov [#allocation9]  }
  0x26   :  { %s52_s15 = sshll.u32 %s2081_s14, 4  ;;  %s66_s17 = sshll.u32 %s2082_s16, 4  ;;  %s53_s15 = int_to_ptr.vmem [resolvable:$true] %s52_s15  ;;  %s2176_s17 = int_to_ptr.vmem [resolvable:$true] %s66_s17 }
  0x27   :  { %s1957_s20 = scalar_lea.hbm %s2545_s3, 512 }
  0x28   :  { %p1958_p2 = scmp.ne.s32.totalorder %s2545_s3, %s1957_s20  ;;  %p1961_p3 = scmp.lt.u32.totalorder %s1957_s20, %s2545_s3 }
  0x2a   :  { %p1963_p4 = pnand %p1961_p3, %p1958_p2 }
  0x2c   :  { %1966 = shalt.err (!%p1963_p4)
}
  0x2d   :  { %s1967_s1 = scalar_lea.vmem %s53_s15, 512  ;;  %p1972_p6 = scmp.lt.s32.totalorder %s53_s15, %s53_s15 }
  0x2e   :  { %p1968_p5 = scmp.ne.s32.totalorder %s53_s15, %s1967_s1  ;;  %p1973_p7 = scmp.lt.s32.totalorder %s1967_s1, %s1967_s1 }
  0x30   :  { %p1974_p8 = por %p1973_p7, %p1972_p6 }
  0x32   :  { %p1975_p9 = pnand %p1974_p8, %p1968_p5 }
  0x34   :  { %1978 = shalt.err (!%p1975_p9)
}
  0x35   :  { %58 = dma.hbm_to_vmem [thread:$0]  %s2545_s3, 512, %s53_s15, [#allocation7], %s2079_s21, %s2079_s21, %s2080_s22  }
  0x36   :  { %s1979_s30 = scalar_lea.hbm %s2547_s5, 512 }
  0x37   :  { %p1980_p10 = scmp.ne.s32.totalorder %s2547_s5, %s1979_s30  ;;  %p1983_p11 = scmp.lt.u32.totalorder %s1979_s30, %s2547_s5 }
  0x39   :  { %p1985_p12 = pnand %p1983_p11, %p1980_p10 }
  0x3b   :  { %1988 = shalt.err (!%p1985_p12)
}
  0x3c   :  { %s1989_s14 = scalar_lea.vmem %s2176_s17, 512  ;;  %p1994_p0 = scmp.lt.s32.totalorder %s2176_s17, %s2176_s17 }
  0x3d   :  { %p1990_p13 = scmp.ne.s32.totalorder %s2176_s17, %s1989_s14  ;;  %p1995_p1 = scmp.lt.s32.totalorder %s1989_s14, %s1989_s14 }
  0x3f   :  { %p1996_p2 = por %p1995_p1, %p1994_p0 }
  0x41   :  { %p1997_p3 = pnand %p1996_p2, %p1990_p13 }
  0x43   :  { %2000 = shalt.err (!%p1997_p3)
}
  0x44   :  { %72 = dma.hbm_to_vmem [thread:$0]  %s2547_s5, 512, %s2176_s17, [#allocation10], %s2079_s21, %s2079_s21, %s2080_s22  }
  0x45   :  { %2067 = dma.done.wait [#allocation4], 512  }
  0x46   :  { %2068 = vsyncadd [#allocation4], 4294966784 }
  0x47   :  { %2069 = dma.done.wait [#allocation7], 768  }
  0x48   :  { %2070 = vsyncadd [#allocation7], 4294966528 }
  0x49   :  { %2071 = dma.done.wait [#allocation10], 512  }
  0x4a   :  { %2072 = vsyncadd [#allocation10], 4294966784  ;;  %vm93_vm0 = vcmask 261120   ;;  %v2213_v0 = vld [vmem:[#allocation6] sm:$0xff]  ;;  %v2217_v2 = vld [vmem:[#allocation6 + $0x8] sm:$0xff]  ;;  %vm266_vm1 = vcmask 64512  }
  0x4b   :  { %v2215_v1 = vld [vmem:[#allocation3] sm:$0xff]  ;;  %1693 = vmatprep.subr.msk.mxu0 %vm93_vm0, %v2213_v0  ;;  %v2223_v3 = vld [vmem:[#allocation3 + $0x10] sm:$0xff]  ;;  %1698 = vmatprep.subr.msk.mxu1 %vm93_vm0, %v2217_v2  ;;  %v2229_v4 = vld [vmem:[#allocation3 + $0x8] sm:$0xff]  ;;  %v2083_v38 = vmov 0.0|0.0   ;;  %vm2084_vm3 = vmmov 0   ;;  %v2085_v53 = vmov 0.0  }
  0x4c   :  { %1695 = vmatprep.mubr.msk.f32.mxu0 %vm93_vm0, %v2215_v1  ;;  %1694 = vmatpush3.xpose.msk.msra.mxu0 %vm93_vm0, %v2213_v0  ;;  %v2235_v5 = vld [vmem:[#allocation3 + $0x18] sm:$0xff]  ;;  %v1792_v48 = vpack.c.bf16 %v2229_v4, %v2215_v1  ;;  %vm1793_vm2 = vmpackc.low %vm93_vm0, %vm93_vm0  ;;  %vm615_vm4 = vcmask 130048  }
  0x4d   :  { %1699 = vmatpush3.xpose.msk.msra.mxu1 %vm93_vm0, %v2217_v2  ;;  %1700 = vmatprep.mubr.msk.f32.mxu1 %vm93_vm0, %v2223_v3  ;;  %v1796_v51 = vpack.c.bf16 %v2235_v5, %v2223_v3 }
  0x4e   :  { %1703 = vmatprep.subr.mxu0 %v2213_v0  ;;  %1708 = vmatprep.subr.mxu1 %v2217_v2 }
  0x4f   :  { %1696 = vmatmul.mubr.msk.f32.vlgmr.msra.gmra.mrb[0].mxu0 %vm93_vm0, %v2229_v4 }
  0x50   :  { %1701 = vmatmul.mubr.msk.f32.vlgmr.msra.gmra.mrb[0].mxu1 %vm93_vm0, %v2235_v5  ;;  %1704 = vmatpush3.msra.mxu0 %v2213_v0 }
  0x51   :  { %1709 = vmatpush3.msra.mxu1 %v2217_v2  ;;  %1791 = vmatprep.subr.bf16.mxu0 %v2083_v38 }
  0x52   :  { %1795 = vmatprep.subr.bf16.mxu1 %v2083_v38 }
 0x122   :  { %v1697_v6 = vpop.f32.mrb[0].mxu0 }
 0x123   :  { %v263_v7 = vmul.f32 0.17677669, %v1697_v6  ;;  %v169_v8 = vpop.f32.mrb[1].mxu0  ;;  %v1702_v9 = vpop.f32.mrb[0].mxu1 }
 0x124   :  { %v262_v10 = vmul.f32 0.17677669, %v169_v8  ;;  %v265_v11 = vmul.f32 0.17677669, %v1702_v9  ;;  %v253_v12 = vpop.f32.mrb[1].mxu1 }
 0x125   :  { %v264_v13 = vmul.f32 0.17677669, %v253_v12  ;;  %v270_v14 = vsel %vm266_vm1, %v263_v7, -inf }
 0x126   :  { %271 = vmax.xlane.f32.xlu1 %v270_v14  ;;  %v267_v15 = vsel %vm266_vm1, %v262_v10, -inf  ;;  %v276_v16 = vsel %vm266_vm1, %v265_v11, -inf }
 0x127   :  { %268 = vmax.xlane.f32.xlu0 %v267_v15  ;;  %v273_v17 = vsel %vm266_vm1, %v264_v13, -inf }
 0x12a   :  { %277 = vmax.xlane.f32.xlu1 %v276_v16 }
 0x12b   :  { %274 = vmax.xlane.f32.xlu0 %v273_v17 }
 0x1b3   :  { %v272_v18 = vpop.xlane.xlu1 %271 }
 0x1b4   :  { %v280_v19 = vsub.f32 %v263_v7, %v272_v18  ;;  %v269_v20 = vpop.xlane.xlu0 %268  ;;  %v788_v18 = vld [vmem:[#allocation8] sm:$0xff] }
 0x1b5   :  { %v279_v21 = vsub.f32 %v262_v10, %v269_v20 }
 0x1b6   :  { %v285_v22 = vmul.f32 1.442695, %v280_v19  ;;  %v789_v19 = vld [vmem:[#allocation8 + $0x8] sm:$0xff] }
 0x1b7   :  { %v283_v23 = vmul.f32 1.442695, %v279_v21  ;;  %v278_v24 = vpop.xlane.xlu1 %277  ;;  %v1805_v20 = vpack.c.bf16 %v789_v19, %v788_v18  ;;  %v1247_v21 = vmul.f32 %v2217_v2, %v2217_v2 }
 0x1b8   :  { %v282_v25 = vsub.f32 %v265_v11, %v278_v24  ;;  %v275_v26 = vpop.xlane.xlu0 %274 }
 0x1b9   :  { %1833 = vpow2.f32 %v283_v23  ;;  %v281_v27 = vsub.f32 %v264_v13, %v275_v26  ;;  %v1251_v23 = vsel %vm93_vm0, %v1247_v21, 0.0 }
 0x1ba   :  { %1835 = vpow2.f32 %v285_v22  ;;  %v289_v28 = vmul.f32 1.442695, %v282_v25  ;;  %v1246_v22 = vmul.f32 %v2213_v0, %v2213_v0 }
 0x1bb   :  { %v287_v29 = vmul.f32 1.442695, %v281_v27  ;;  %v790_v27 = vld [vmem:[#allocation8 + $0x10] sm:$0xff] }
 0x1bc   :  { %v1248_v24 = vsel %vm93_vm0, %v1246_v22, 0.0 }
 0x1bd   :  { %1837 = vpow2.f32 %v287_v29 }
 0x1be   :  { %1839 = vpow2.f32 %v289_v28  ;;  %v791_v28 = vld [vmem:[#allocation8 + $0x18] sm:$0xff] }
 0x1c3   :  { %v1834_v30 = vpop.eup %1833 }
 0x1c4   :  { %v291_v31 = vsel %vm266_vm1, %v1834_v30, 0.0  ;;  %v1836_v32 = vpop.eup %1835 }
 0x1c5   :  { %292 = vadd.xlane.f32.xlu0 %v291_v31  ;;  %v294_v34 = vsel %vm266_vm1, %v1836_v32, 0.0  ;;  %v1809_v31 = vpack.c.bf16 %v791_v28, %v790_v27 }
 0x1c7   :  { %v1838_v33 = vpop.eup %1837 }
 0x1c8   :  { %v297_v35 = vsel %vm266_vm1, %v1838_v33, 0.0  ;;  %v1840_v36 = vpop.eup %1839 }
 0x1c9   :  { %295 = vadd.xlane.f32.xlu0 %v294_v34  ;;  %298 = vadd.xlane.f32.xlu1 %v297_v35  ;;  %v300_v37 = vsel %vm266_vm1, %v1840_v36, 0.0  ;;  %v792_v34 = vld [vmem:[#allocation9] sm:$0xff]  ;;  %v793_v35 = vld [vmem:[#allocation9 + $0x8] sm:$0xff] }
 0x1cd   :  { %301 = vadd.xlane.f32.xlu1 %v300_v37  ;;  %v794_v37 = vld [vmem:[#allocation9 + $0x10] sm:$0xff] }
 0x252   :  { %v293_v39 = vpop.xlane.xlu0 %292 }
 0x253   :  { %1841 = vrcp.f32 %v293_v39 }
 0x256   :  { %v299_v40 = vpop.xlane.xlu1 %298  ;;  %v296_v41 = vpop.xlane.xlu0 %295 }
 0x257   :  { %1843 = vrcp.f32 %v299_v40 }
 0x258   :  { %1845 = vrcp.f32 %v296_v41 }
 0x25a   :  { %v302_v42 = vpop.xlane.xlu1 %301 }
 0x25b   :  { %1847 = vrcp.f32 %v302_v42 }
 0x25d   :  { %v1842_v43 = vpop.eup %1841 }
 0x25e   :  { %v304_v44 = vmul.f32 %v1842_v43, %v1834_v30 }
 0x260   :  { %1705 = vmatprep.mubr.msk.f32.mxu0 %vm266_vm1, %v304_v44 }
 0x261   :  { %v1844_v45 = vpop.eup %1843 }
 0x262   :  { %v1846_v46 = vpop.eup %1845  ;;  %v308_v47 = vmul.f32 %v1844_v45, %v1838_v33 }
 0x263   :  { %v306_v49 = vmul.f32 %v1846_v46, %v1836_v32 }
 0x264   :  { %1710 = vmatprep.mubr.msk.f32.mxu1 %vm266_vm1, %v308_v47  ;;  %v1619_v47 = vld [vmem:[%s2546_s4] ss:$0 sm:$0xff] }
 0x265   :  { %v1848_v50 = vpop.eup %1847  ;;  %1706 = vmatmul.mubr.msk.f32.vlgmr.msra.gmra.mrb[2].mxu0 %vm266_vm1, %v306_v49 }
 0x266   :  { %v310_v52 = vmul.f32 %v1848_v50, %v1840_v36  ;;  %1794 = vmatpush3.bf16.xpose.msk.msra.mxu0 %vm1793_vm2, %v1792_v48  ;;  %1717 = vmatprep.mubr.msk.f32.mxu0 %vm2084_vm3, %v2085_v53  ;;  %v1813_v36 = vpack.c.bf16 %v793_v35, %v792_v34 }
 0x267   :  { %1799 = vmatprep.subr.bf16.mxu0 %v2083_v38 }
 0x268   :  { %1711 = vmatmul.mubr.msk.f32.vlgmr.msra.gmra.mrb[2].mxu1 %vm266_vm1, %v310_v52 }
 0x269   :  { %1798 = vmatpush3.bf16.xpose.msk.msra.mxu1 %vm1793_vm2, %v1796_v51  ;;  %1724 = vmatprep.mubr.msk.f32.mxu1 %vm2084_vm3, %v2085_v53 }
 0x26a   :  { %1802 = vmatprep.subr.bf16.mxu1 %v2083_v38  ;;  %v795_v38 = vld [vmem:[#allocation9 + $0x18] sm:$0xff] }
 0x26b   :  { %v1817_v39 = vpack.c.bf16 %v795_v38, %v794_v37 }
 0x26d   :  { %1718 = vmatmul.mubr.msk.f32.vlgmr.msra.gmra.mrb[4].mxu0 %vm93_vm0, %v2213_v0 }
 0x26e   :  { %1801 = vmatpush3.bf16.msra.mxu0 %v1792_v48  ;;  %1731 = vmatprep.mubr.msk.f32.mxu0 %vm2084_vm3, %v2085_v53 }
 0x26f   :  { %1806 = vmatprep.subr.bf16.mxu0 %v1805_v20 }
 0x270   :  { %1725 = vmatmul.mubr.msk.f32.vlgmr.msra.gmra.mrb[4].mxu1 %vm93_vm0, %v2217_v2 }
 0x271   :  { %1804 = vmatpush3.bf16.msra.mxu1 %v1796_v51  ;;  %1738 = vmatprep.mubr.msk.f32.mxu1 %vm2084_vm3, %v2085_v53 }
 0x272   :  { %1814 = vmatprep.subr.bf16.mxu1 %v1813_v36 }
 0x338   :  { %v2275_v54 = vpop.f32.mrb[2].mxu0 }
 0x339   :  { %785 = vst.msk [vmem:[#allocation11 + $0x8] sm:$0xff] %vm93_vm0, %v2275_v54  ;;  %v2279_v55 = vpop.f32.mrb[3].mxu0 }
 0x33a   :  { %784 = vst.msk [vmem:[#allocation11] sm:$0xff] %vm93_vm0, %v2279_v55 }
 0x33b   :  { %v2283_v56 = vpop.f32.mrb[2].mxu1 }
 0x33c   :  { %787 = vst.msk [vmem:[#allocation11 + $0x18] sm:$0xff] %vm93_vm0, %v2283_v56  ;;  %v2287_v57 = vpop.f32.mrb[3].mxu1 }
 0x33d   :  { %786 = vst.msk [vmem:[#allocation11 + $0x10] sm:$0xff] %vm93_vm0, %v2287_v57 }
 0x340   :  { %v539_v58 = vpop.f32.mrb[4].mxu0 }
 0x341   :  { %v613_v59 = vmul.f32 0.17677669, %v539_v58  ;;  %v1719_v60 = vpop.f32.mrb[5].mxu0 }
 0x343   :  { %v609_v61 = vpop.f32.mrb[4].mxu1  ;;  %v616_v62 = vsel %vm615_vm4, %v613_v59, -inf }
 0x344   :  { %v614_v63 = vmul.f32 0.17677669, %v609_v61  ;;  %617 = vmax.xlane.f32.xlu0 %v616_v62  ;;  %v1726_v6 = vpop.f32.mrb[5].mxu1 }
 0x346   :  { %v619_v7 = vsel %vm615_vm4, %v614_v63, -inf }
 0x347   :  { %620 = vmax.xlane.f32.xlu1 %v619_v7 }
 0x3d1   :  { %v618_v8 = vpop.xlane.xlu0 %617 }
 0x3d2   :  { %v622_v9 = vsub.f32 %v613_v59, %v618_v8 }
 0x3d4   :  { %v624_v10 = vmul.f32 1.442695, %v622_v9  ;;  %v621_v11 = vpop.xlane.xlu1 %620 }
 0x3d5   :  { %v623_v12 = vsub.f32 %v614_v63, %v621_v11 }
 0x3d6   :  { %1849 = vpow2.f32 %v624_v10 }
 0x3d7   :  { %v626_v13 = vmul.f32 1.442695, %v623_v12 }
 0x3d9   :  { %1851 = vpow2.f32 %v626_v13 }
 0x3e0   :  { %v1850_v14 = vpop.eup %1849 }
 0x3e1   :  { %v628_v15 = vsel %vm615_vm4, %v1850_v14, 0.0 }
 0x3e2   :  { %629 = vadd.xlane.f32.xlu0 %v628_v15 }
 0x3e3   :  { %v1852_v16 = vpop.eup %1851 }
 0x3e4   :  { %v631_v17 = vsel %vm615_vm4, %v1852_v16, 0.0 }
 0x3e5   :  { %632 = vadd.xlane.f32.xlu1 %v631_v17 }
 0x3e6   :  { %1249 = vadd.xlane.f32.xlu0 %v1248_v24 }
 0x3e9   :  { %1252 = vadd.xlane.f32.xlu1 %v1251_v23 }
 0x46f   :  { %v630_v25 = vpop.xlane.xlu0 %629 }
 0x470   :  { %1853 = vrcp.f32 %v630_v25 }
 0x472   :  { %v633_v26 = vpop.xlane.xlu1 %632 }
 0x473   :  { %1855 = vrcp.f32 %v633_v26  ;;  %v1250_v52 = vpop.xlane.xlu0 %1249 }
 0x474   :  { %v1254_v63 = vmax.f32 %v1250_v52, 1e-24 }
 0x476   :  { %v1253_v62 = vpop.xlane.xlu1 %1252  ;;  %1857 = vrsqrt.f32 %v1254_v63 }
 0x477   :  { %v1255_v10 = vmax.f32 %v1253_v62, 1e-24 }
 0x479   :  { %1859 = vrsqrt.f32 %v1255_v10 }
 0x47a   :  { %v1854_v29 = vpop.eup %1853 }
 0x47b   :  { %v635_v30 = vmul.f32 %v1854_v29, %v1850_v14 }
 0x47d   :  { %v1856_v32 = vpop.eup %1855  ;;  %1732 = vmatmul.mubr.msk.f32.vlgmr.msra.gmra.mrb[6].mxu0 %vm615_vm4, %v635_v30 }
 0x47e   :  { %v637_v33 = vmul.f32 %v1856_v32, %v1852_v16  ;;  %1808 = vmatpush3.bf16.msra.mxu0 %v1805_v20  ;;  %1749 = vmatprep.mubr.msk.f32.mxu0 %vm93_vm0, %v2215_v1 }
 0x47f   :  { %1810 = vmatprep.subr.bf16.mxu0 %v1809_v31 }
 0x480   :  { %1739 = vmatmul.mubr.msk.f32.vlgmr.msra.gmra.mrb[6].mxu1 %vm615_vm4, %v637_v33  ;;  %v1858_v24 = vpop.eup %1857  ;;  %v1628_v33 = vld [vmem:[%s2548_s6] ss:$0 sm:$0xff] }
 0x481   :  { %1816 = vmatpush3.bf16.msra.mxu1 %v1813_v36  ;;  %v2347_v26 = vmul.f32 %v1858_v24, %v2213_v0 }
 0x482   :  { %1812 = vmatpush3.bf16.msra.mxu0 %v1809_v31  ;;  %1818 = vmatprep.subr.bf16.mxu1 %v1817_v39 }
 0x483   :  { %1781 = vmatprep.subr.mxu0 %v2085_v53  ;;  %v1860_v25 = vpop.eup %1859 }
 0x484   :  { %v2352_v27 = vmul.f32 %v1860_v25, %v2217_v2  ;;  %v1112_v25 = vmul.f32 %v2279_v55, %v2279_v55 }
 0x485   :  { %1750 = vmatmul.mubr.msk.f32.vlgmr.msra.gmra.mrb[8].mxu0 %vm93_vm0, %v2229_v4  ;;  %1820 = vmatpush3.bf16.msra.mxu1 %v1817_v39 }
 0x486   :  { %1752 = vmatprep.mubr.msk.f32.mxu0 %vm93_vm0, %v2223_v3  ;;  %1786 = vmatprep.subr.mxu1 %v2085_v53 }
 0x489   :  { %1753 = vmatmul.mubr.msk.f32.gmra.mrb[10].mxu0 %vm93_vm0, %v2235_v5 }
 0x48a   :  { %1755 = vmatprep.mubr.msk.f32.mxu0 %vm93_vm0, %v2279_v55 }
 0x48b   :  { %1782 = vmatpush3.xpose.msk.msra.mxu0 %vm93_vm0, %v2347_v26 }
 0x48d   :  { %1756 = vmatmul.mubr.msk.f32.gmra.mrb[12].mxu0 %vm93_vm0, %v2275_v54 }
 0x48e   :  { %1758 = vmatprep.mubr.msk.f32.mxu0 %vm93_vm0, %v2287_v57 }
 0x491   :  { %1759 = vmatmul.mubr.msk.f32.gmra.mrb[14].mxu0 %vm93_vm0, %v2283_v56 }
 0x492   :  { %1783 = vmatprep.mubr.msk.f32.mxu0 %vm2084_vm3, %v2085_v53 }
 0x550   :  { %v2323_v40 = vpop.f32.mrb[6].mxu0 }
 0x551   :  { %v1260_v41 = vmul.f32 %v2323_v40, %v2323_v40  ;;  %v1733_v42 = vpop.f32.mrb[7].mxu0 }
 0x553   :  { %v2327_v43 = vpop.f32.mrb[6].mxu1  ;;  %v1262_v44 = vsel %vm93_vm0, %v1260_v41, 0.0 }
 0x554   :  { %v1261_v45 = vmul.f32 %v2327_v43, %v2327_v43  ;;  %1263 = vadd.xlane.f32.xlu0 %v1262_v44  ;;  %v1740_v46 = vpop.f32.mrb[7].mxu1 }
 0x556   :  { %v1265_v48 = vsel %vm93_vm0, %v1261_v45, 0.0 }
 0x557   :  { %1266 = vadd.xlane.f32.xlu1 %v1265_v48 }
 0x558   :  { %v1751_v49 = vpop.f32.mrb[8].mxu0 }
 0x559   :  { %v888_v50 = vadd.f32 %v1751_v49, %v1619_v47  ;;  %v882_v51 = vpop.f32.mrb[9].mxu0 }
 0x55a   :  { %v883_v58 = vadd.f32 %v1619_v47, %v882_v51 }
 0x55b   :  { %v922_v59 = vmax.f32 %v888_v50, 0.0  ;;  %v2384_v50 = vstv %s2542_s0  ;;  %s2086_s0 = smov [#allocation11]  }
 0x55c   :  { %v921_v60 = vmax.f32 %v883_v58, 0.0  ;;  %v1754_v61 = vpop.f32.mrb[10].mxu0  ;;  %s1560_s19 = sshll.u32 %s2086_s0, 4  ;;  %s1561_s19 = int_to_ptr.vmem [resolvable:$true] %s1560_s19 }
 0x55d   :  { %v898_v6 = vadd.f32 %v1754_v61, %v1619_v47  ;;  %v892_v7 = vpop.f32.mrb[11].mxu0  ;;  %s2001_s20 = scalar_lea.vmem %s1561_s19, 512  ;;  %p2006_p5 = scmp.lt.s32.totalorder %s1561_s19, %s1561_s19 }
 0x55e   :  { %v893_v8 = vadd.f32 %v1619_v47, %v892_v7  ;;  %1769 = vmatprep.mubr.msk.f32.mxu1 %vm93_vm0, %v921_v60  ;;  %p2002_p4 = scmp.ne.s32.totalorder %s1561_s19, %s2001_s20  ;;  %p2007_p6 = scmp.lt.s32.totalorder %s2001_s20, %s2001_s20 }
 0x55f   :  { %v924_v9 = vmax.f32 %v898_v6, 0.0  ;;  %1770 = vmatmul.mubr.msk.f32.vlgmr.msra.gmra.mrb[8].mxu1 %vm93_vm0, %v922_v59 }
 0x560   :  { %v923_v11 = vmax.f32 %v893_v8, 0.0  ;;  %v1757_v12 = vpop.f32.mrb[12].mxu0  ;;  %1787 = vmatpush3.xpose.msk.msra.mxu1 %vm93_vm0, %v2352_v27  ;;  %p2008_p7 = por %p2007_p6, %p2006_p5 }
 0x561   :  { %v908_v13 = vadd.f32 %v1757_v12, %v1619_v47  ;;  %v902_v14 = vpop.f32.mrb[13].mxu0 }
 0x562   :  { %v903_v15 = vadd.f32 %v1619_v47, %v902_v14  ;;  %1772 = vmatprep.mubr.msk.f32.mxu1 %vm93_vm0, %v923_v11  ;;  %p2009_p8 = pnand %p2008_p7, %p2002_p4 }
 0x563   :  { %1773 = vmatmul.mubr.msk.f32.gmra.mrb[10].mxu1 %vm93_vm0, %v924_v9  ;;  %v926_v18 = vmax.f32 %v908_v13, 0.0 }
 0x564   :  { %v925_v16 = vmax.f32 %v903_v15, 0.0  ;;  %v1760_v17 = vpop.f32.mrb[14].mxu0 }
 0x565   :  { %v918_v19 = vadd.f32 %v1760_v17, %v1619_v47  ;;  %v912_v20 = vpop.f32.mrb[15].mxu0 }
 0x566   :  { %v913_v21 = vadd.f32 %v1619_v47, %v912_v20  ;;  %1775 = vmatprep.mubr.msk.f32.mxu1 %vm93_vm0, %v925_v16 }
 0x567   :  { %1776 = vmatmul.mubr.msk.f32.gmra.mrb[12].mxu1 %vm93_vm0, %v926_v18  ;;  %v928_v23 = vmax.f32 %v918_v19, 0.0 }
 0x568   :  { %v927_v22 = vmax.f32 %v913_v21, 0.0 }
 0x56a   :  { %1778 = vmatprep.mubr.msk.f32.mxu1 %vm93_vm0, %v927_v22 }
 0x56b   :  { %1779 = vmatmul.mubr.msk.f32.gmra.mrb[14].mxu1 %vm93_vm0, %v928_v23 }
 0x56c   :  { %1788 = vmatprep.mubr.msk.f32.mxu1 %vm2084_vm3, %v2085_v53 }
 0x5e1   :  { %v1264_v28 = vpop.xlane.xlu0 %1263 }
 0x5e2   :  { %v1268_v29 = vmax.f32 %v1264_v28, 1e-24 }
 0x5e4   :  { %1861 = vrsqrt.f32 %v1268_v29  ;;  %v1267_v30 = vpop.xlane.xlu1 %1266  ;;  %v1113_v29 = vmul.f32 %v2275_v54, %v2275_v54 }
 0x5e5   :  { %v1269_v31 = vmax.f32 %v1267_v30, 1e-24  ;;  %v1120_v30 = vsel %vm93_vm0, %v1112_v25, 0.0 }
 0x5e7   :  { %1863 = vrsqrt.f32 %v1269_v31  ;;  %v1114_v31 = vmul.f32 %v2287_v57, %v2287_v57 }
 0x5ee   :  { %v1862_v53 = vpop.eup %1861 }
 0x5ef   :  { %v2357_v32 = vmul.f32 %v1862_v53, %v2323_v40  ;;  %v1116_v53 = vmul.f32 %v2215_v1, %v2215_v1 }
 0x5f1   :  { %v1864_v0 = vpop.eup %1863  ;;  %1784 = vmatmul.mubr.msk.f32.vlgmr.msra.gmra.mrb[16].mxu0 %vm93_vm0, %v2357_v32 }
 0x5f2   :  { %v2362_v2 = vmul.f32 %v1864_v0, %v2327_v43  ;;  %v1123_v0 = vsel %vm93_vm0, %v1113_v29, 0.0 }
 0x5f4   :  { %1789 = vmatmul.mubr.msk.f32.vlgmr.msra.gmra.mrb[16].mxu1 %vm93_vm0, %v2362_v2 }
 0x632   :  { %v1771_v34 = vpop.f32.mrb[8].mxu1 }
 0x633   :  { %v1031_v35 = vadd.f32 %v1771_v34, %v1628_v33  ;;  %v1025_v36 = vpop.f32.mrb[9].mxu1  ;;  %v1132_v34 = vsel %vm93_vm0, %v1116_v53, 0.0 }
 0x634   :  { %v1026_v37 = vadd.f32 %v1628_v33, %v1025_v36 }
 0x635   :  { %v2370_v38 = vmul.f32 %v2275_v54, %v1031_v35  ;;  %v1065_v7 = vmul.f32 %v1031_v35, %v1031_v35  ;;  %v1117_v54 = vmul.f32 %v2229_v4, %v2229_v4 }
 0x636   :  { %v1774_v39 = vpop.f32.mrb[10].mxu1  ;;  %v2373_v40 = vmul.f32 %v1026_v37, %v2279_v55  ;;  %v1064_v61 = vmul.f32 %v1026_v37, %v1026_v37  ;;  %v1115_v55 = vmul.f32 %v2283_v56, %v2283_v56 }
 0x637   :  { %v1041_v41 = vadd.f32 %v1774_v39, %v1628_v33  ;;  %v1035_v42 = vpop.f32.mrb[11].mxu1  ;;  %v1075_v12 = vsel %vm93_vm0, %v1065_v7, 0.0  ;;  %v1135_v36 = vsel %vm93_vm0, %v1117_v54, 0.0 }
 0x638   :  { %v1036_v43 = vadd.f32 %v1628_v33, %v1035_v42  ;;  %v1072_v9 = vsel %vm93_vm0, %v1064_v61, 0.0  ;;  %v1129_v35 = vsel %vm93_vm0, %v1115_v55, 0.0  ;;  %v1171_v42 = vsel %vm93_vm0, %v2370_v38, 0.0 }
 0x639   :  { %v2376_v44 = vmul.f32 %v2283_v56, %v1041_v41  ;;  %v1067_v13 = vmul.f32 %v1041_v41, %v1041_v41  ;;  %v1119_v56 = vmul.f32 %v2235_v5, %v2235_v5  ;;  %v1168_v41 = vsel %vm93_vm0, %v2373_v40, 0.0 }
 0x63a   :  { %v1777_v45 = vpop.f32.mrb[12].mxu1  ;;  %v2379_v46 = vmul.f32 %v1036_v43, %v2287_v57  ;;  %v1066_v10 = vmul.f32 %v1036_v43, %v1036_v43  ;;  %v1118_v57 = vmul.f32 %v2223_v3, %v2223_v3 }
 0x63b   :  { %v1045_v47 = vpop.f32.mrb[13].mxu1  ;;  %v2402_v11 = vadd.f32 %v1777_v45, %v1628_v33  ;;  %v1081_v18 = vsel %vm93_vm0, %v1067_v13, 0.0  ;;  %v1141_v39 = vsel %vm93_vm0, %v1119_v56, 0.0  ;;  %v1177_v56 = vsel %vm93_vm0, %v2376_v44, 0.0 }
 0x63c   :  { %v2399_v8 = vadd.f32 %v1628_v33, %v1045_v47  ;;  %v1078_v15 = vsel %vm93_vm0, %v1066_v10, 0.0  ;;  %v1138_v37 = vsel %vm93_vm0, %v1118_v57, 0.0 }
 0x63d   :  { %v1069_v19 = vmul.f32 %v2402_v11, %v2402_v11 }
 0x63e   :  { %v1780_v48 = vpop.f32.mrb[14].mxu1  ;;  %v1068_v16 = vmul.f32 %v2399_v8, %v2399_v8 }
 0x63f   :  { %v1055_v49 = vpop.f32.mrb[15].mxu1  ;;  %v2410_v17 = vadd.f32 %v1780_v48, %v1628_v33  ;;  %v1087_v22 = vsel %vm93_vm0, %v1069_v19, 0.0 }
 0x640   :  { %v2405_v14 = vadd.f32 %v1628_v33, %v1055_v49  ;;  %v1084_v20 = vsel %vm93_vm0, %v1068_v16, 0.0  ;;  %v1126_v33 = vsel %vm93_vm0, %v1114_v31, 0.0 }
 0x641   :  { %v1071_v23 = vmul.f32 %v2410_v17, %v2410_v17 }
 0x642   :  { %v1070_v21 = vmul.f32 %v2405_v14, %v2405_v14 }
 0x643   :  { %v1093_v28 = vsel %vm93_vm0, %v1071_v23, 0.0 }
 0x644   :  { %v1090_v24 = vsel %vm93_vm0, %v1070_v21, 0.0 }
 0x6c4   :  { %v1346_v51 = vpop.f32.mrb[16].mxu0 }
 0x6c5   :  { %v2387_v52 = vmul.f32 %v2384_v50, %v1346_v51  ;;  %v1785_v58 = vpop.f32.mrb[17].mxu0 }
 0x6c7   :  { %v2391_v59 = vsel %vm266_vm1, %v2387_v52, -inf  ;;  %v1422_v60 = vpop.f32.mrb[16].mxu1 }
 0x6c8   :  { %1440 = vmax.xlane.f32.xlu0 %v2391_v59  ;;  %v2395_v62 = vmul.f32 %v2384_v50, %v1422_v60  ;;  %v1790_v63 = vpop.f32.mrb[17].mxu1  ;;  %v1463_v43 = vrot.slane %v2391_v59, 4 }
 0x6ca   :  { %v1442_v6 = vsel %vm266_vm1, %v2395_v62, -inf  ;;  %v1464_v47 = vmax.f32 %v2391_v59, %v1463_v43 }
 0x6cb   :  { %1443 = vmax.xlane.f32.xlu1 %v1442_v6  ;;  %v1469_v45 = vrot.slane %v1442_v6, 4 }
 0x6cc   :  { %1073 = vadd.xlane.f32.xlu0 %v1072_v9  ;;  %v1465_v49 = vrot.slane %v1464_v47, 2 }
 0x6cd   :  { %v1470_v48 = vmax.f32 %v1442_v6, %v1469_v45 }
 0x6ce   :  { %v1466_v58 = vmax.f32 %v1464_v47, %v1465_v49 }
 0x6cf   :  { %1076 = vadd.xlane.f32.xlu1 %v1075_v12  ;;  %v1471_v51 = vrot.slane %v1470_v48, 2 }
 0x6d0   :  { %1079 = vadd.xlane.f32.xlu0 %v1078_v15  ;;  %v1467_v61 = vrot.slane %v1466_v58, 1 }
 0x6d1   :  { %v1472_v60 = vmax.f32 %v1470_v48, %v1471_v51 }
 0x6d2   :  { %v2453_v7 = vmax.f32 %v1466_v58, %v1467_v61 }
 0x6d3   :  { %1082 = vadd.xlane.f32.xlu1 %v1081_v18  ;;  %v1473_v63 = vrot.slane %v1472_v60, 1 }
 0x6d4   :  { %1085 = vadd.xlane.f32.xlu0 %v1084_v20  ;;  %v1475_v38 = vsub.f32 %v2387_v52, %v2453_v7 }
 0x6d5   :  { %v2455_v40 = vmax.f32 %v1472_v60, %v1473_v63 }
 0x6d6   :  { %v1477_v10 = vmul.f32 1.442695, %v1475_v38 }
 0x6d7   :  { %1088 = vadd.xlane.f32.xlu1 %v1087_v22  ;;  %v1476_v9 = vsub.f32 %v2395_v62, %v2455_v40 }
 0x6d8   :  { %1091 = vadd.xlane.f32.xlu0 %v1090_v24  ;;  %1865 = vpow2.f32 %v1477_v10 }
 0x6d9   :  { %v1479_v12 = vmul.f32 1.442695, %v1476_v9 }
 0x6db   :  { %1094 = vadd.xlane.f32.xlu1 %v1093_v28  ;;  %1867 = vpow2.f32 %v1479_v12 }
 0x6dc   :  { %1121 = vadd.xlane.f32.xlu0 %v1120_v30 }
 0x6df   :  { %1124 = vadd.xlane.f32.xlu1 %v1123_v0 }
 0x6e0   :  { %1127 = vadd.xlane.f32.xlu0 %v1126_v33 }
 0x6e2   :  { %v1866_v59 = vpop.eup %1865 }
 0x6e3   :  { %1130 = vadd.xlane.f32.xlu1 %v1129_v35  ;;  %v1481_v13 = vsel %vm266_vm1, %v1866_v59, 0.0 }
 0x6e4   :  { %1133 = vadd.xlane.f32.xlu0 %v1132_v34  ;;  %v1482_v15 = vrot.slane %v1481_v13, 4 }
 0x6e5   :  { %v1868_v6 = vpop.eup %1867 }
 0x6e6   :  { %v1488_v16 = vsel %vm266_vm1, %v1868_v6, 0.0  ;;  %v1483_v19 = vadd.f32 %v1482_v15, %v1481_v13 }
 0x6e7   :  { %1136 = vadd.xlane.f32.xlu1 %v1135_v36  ;;  %v1489_v18 = vrot.slane %v1488_v16, 4  ;;  %v1164_v36 = vmul.f32 %v2399_v8, %v2215_v1  ;;  %v1167_v1 = vmul.f32 %v2410_v17, %v2235_v5 }
 0x6e8   :  { %1139 = vadd.xlane.f32.xlu0 %v1138_v37  ;;  %v1484_v21 = vrot.slane %v1483_v19, 2  ;;  %v1165_v37 = vmul.f32 %v2402_v11, %v2229_v4  ;;  %v1429_v4 = vmul.f32 %v2357_v32, %v2347_v26 }
 0x6e9   :  { %v1490_v20 = vadd.f32 %v1489_v18, %v1488_v16  ;;  %v1189_v43 = vsel %vm93_vm0, %v1167_v1, 0.0 }
 0x6ea   :  { %v1485_v29 = vadd.f32 %v1484_v21, %v1483_v19  ;;  %v1431_v45 = vsel %vm93_vm0, %v1429_v4, 0.0 }
 0x6eb   :  { %1142 = vadd.xlane.f32.xlu1 %v1141_v39  ;;  %v1491_v24 = vrot.slane %v1490_v20, 2  ;;  %v1180_v39 = vsel %vm93_vm0, %v1164_v36, 0.0 }
 0x6ec   :  { %1169 = vadd.xlane.f32.xlu0 %v1168_v41  ;;  %v1486_v0 = vrot.slane %v1485_v29, 1  ;;  %v1166_v41 = vmul.f32 %v2405_v14, %v2223_v3  ;;  %v1430_v3 = vmul.f32 %v2362_v2, %v2352_v27 }
 0x6ed   :  { %v1492_v53 = vadd.f32 %v1491_v24, %v1490_v20 }
 0x6ee   :  { %v1487_v33 = vadd.f32 %v1486_v0, %v1485_v29  ;;  %v1186_v44 = vsel %vm93_vm0, %v1166_v41, 0.0  ;;  %v1434_v17 = vsel %vm93_vm0, %v1430_v3, 0.0 }
 0x6ef   :  { %1172 = vadd.xlane.f32.xlu1 %v1171_v42  ;;  %v1493_v55 = vrot.slane %v1492_v53, 1 }
 0x6f1   :  { %v1494_v54 = vadd.f32 %v1493_v55, %v1492_v53 }
 0x755   :  { %v2463_v22 = vpop.xlane.xlu0 %1440 }
 0x756   :  { %v1445_v23 = vsub.f32 %v2387_v52, %v2463_v22 }
 0x758   :  { %v1447_v25 = vmul.f32 1.442695, %v1445_v23  ;;  %v2467_v28 = vpop.xlane.xlu1 %1443 }
 0x759   :  { %v1446_v30 = vsub.f32 %v2395_v62, %v2467_v28  ;;  %v1174_v62 = vsel %vm93_vm0, %v2379_v46, 0.0  ;;  %v1183_v46 = vsel %vm93_vm0, %v1165_v37, 0.0 }
 0x75a   :  { %1869 = vpow2.f32 %v1447_v25 }
 0x75b   :  { %v1449_v31 = vmul.f32 1.442695, %v1446_v30 }
 0x75d   :  { %1871 = vpow2.f32 %v1449_v31 }
 0x75e   :  { %1873 = vlog2.f32 %v1487_v33 }
 0x75f   :  { %1875 = vlog2.f32 %v1494_v54 }
 0x764   :  { %v1870_v34 = vpop.eup %1869 }
 0x765   :  { %v1451_v52 = vsel %vm266_vm1, %v1870_v34, 0.0 }
 0x766   :  { %1452 = vadd.xlane.f32.xlu0 %v1451_v52 }
 0x767   :  { %v1872_v57 = vpop.eup %1871 }
 0x768   :  { %v1454_v35 = vsel %vm266_vm1, %v1872_v57, 0.0  ;;  %v1874_v42 = vpop.eup %1873 }
 0x769   :  { %1455 = vadd.xlane.f32.xlu1 %v1454_v35  ;;  %v1876_v8 = vpop.eup %1875  ;;  %v1496_v11 = vmul.f32 0.6931472, %v1874_v42 }
 0x76a   :  { %1175 = vadd.xlane.f32.xlu0 %v1174_v62  ;;  %v1498_v14 = vmul.f32 0.6931472, %v1876_v8 }
 0x76b   :  { %v1499_v5 = vadd.f32 %v1496_v11, %v2453_v7 }
 0x76c   :  { %v1500_v47 = vadd.f32 %v1498_v14, %v2455_v40 }
 0x76d   :  { %1178 = vadd.xlane.f32.xlu1 %v1177_v56  ;;  %v1516_v26 = vsel %vm266_vm1, %v1499_v5, 0.0 }
 0x76e   :  { %1181 = vadd.xlane.f32.xlu0 %v1180_v39  ;;  %v1519_v32 = vsel %vm266_vm1, %v1500_v47, 0.0 }
 0x771   :  { %1184 = vadd.xlane.f32.xlu1 %v1183_v46 }
 0x772   :  { %1187 = vadd.xlane.f32.xlu0 %v1186_v44 }
 0x775   :  { %1190 = vadd.xlane.f32.xlu1 %v1189_v43 }
 0x776   :  { %1432 = vadd.xlane.f32.xlu0 %v1431_v45 }
 0x779   :  { %1435 = vadd.xlane.f32.xlu1 %v1434_v17 }
 0x77a   :  { %1517 = vadd.xlane.f32.xlu0 %v1516_v26 }
 0x77d   :  { %1520 = vadd.xlane.f32.xlu1 %v1519_v32 }
 0x77e   :  { %2012 = shalt.err (!%p2009_p8)
}
 0x77f   :  { %s2013_s25 = scalar_lea.hbm %s2549_s7, 512 }
 0x780   :  { %p2014_p9 = scmp.ne.s32.totalorder %s2549_s7, %s2013_s25  ;;  %p2017_p10 = scmp.lt.u32.totalorder %s2013_s25, %s2549_s7 }
 0x782   :  { %p2019_p11 = pnand %p2017_p10, %p2014_p9 }
 0x784   :  { %2022 = shalt.err (!%p2019_p11)
}
 0x785   :  { %1566 = dma.vmem_to_hbm [thread:$0]  %s1561_s19, 512, %s2549_s7, [#allocation5], %s2079_s21, %s2079_s21, %s2080_s22   ;;  %v1077_v27 = vpop.xlane.xlu1 %1076  ;;  %v1074_v2 = vpop.xlane.xlu0 %1073  ;;  %vm1546_vm5 = vcmask 1041409  }
 0x786   :  { %v1097_v9 = vmax.f32 %v1077_v27, 1e-16  ;;  %v1096_v12 = vmax.f32 %v1074_v2, 1e-16  ;;  %s2087_s7 = smov [#allocation12]   ;;  %s2088_s22 = smov [#allocation14]  }
 0x787   :  { %s1573_s21 = sshll.u32 %s2087_s7, 4  ;;  %s1583_s30 = sshll.u32 %s2088_s22, 4  ;;  %s1574_s21 = int_to_ptr.vmem [resolvable:$true] %s1573_s21  ;;  %s1584_s30 = int_to_ptr.vmem [resolvable:$true] %s1583_s30 }
 0x788   :  { %1877 = vrsqrt.f32 %v1097_v9  ;;  %s2023_s11 = scalar_lea.vmem %s1574_s21, 32  ;;  %p2028_p13 = scmp.lt.s32.totalorder %s1574_s21, %s1574_s21 }
 0x789   :  { %v1083_v48 = vpop.xlane.xlu1 %1082  ;;  %v1080_v49 = vpop.xlane.xlu0 %1079  ;;  %1879 = vrsqrt.f32 %v1096_v12  ;;  %p2024_p12 = scmp.ne.s32.totalorder %s1574_s21, %s2023_s11  ;;  %p2029_p0 = scmp.lt.s32.totalorder %s2023_s11, %s2023_s11 }
 0x78a   :  { %v1098_v18 = vmax.f32 %v1080_v49, 1e-16  ;;  %v1099_v19 = vmax.f32 %v1083_v48, 1e-16 }
 0x78b   :  { %p2030_p1 = por %p2029_p0, %p2028_p13 }
 0x78d   :  { %v1089_v51 = vpop.xlane.xlu1 %1088  ;;  %v1086_v58 = vpop.xlane.xlu0 %1085  ;;  %p2031_p2 = pnand %p2030_p1, %p2024_p12 }
 0x78e   :  { %v1100_v20 = vmax.f32 %v1086_v58, 1e-16  ;;  %v1101_v23 = vmax.f32 %v1089_v51, 1e-16 }
 0x791   :  { %v1095_v60 = vpop.xlane.xlu1 %1094  ;;  %v1092_v61 = vpop.xlane.xlu0 %1091 }
 0x792   :  { %v1878_v24 = vpop.eup %1877  ;;  %v1102_v0 = vmax.f32 %v1092_v61, 1e-16  ;;  %v1103_v62 = vmax.f32 %v1095_v60, 1e-16 }
 0x793   :  { %v1880_v53 = vpop.eup %1879 }
 0x795   :  { %v1125_v63 = vpop.xlane.xlu1 %1124  ;;  %v1122_v7 = vpop.xlane.xlu0 %1121 }
 0x796   :  { %v1145_v6 = vmax.f32 %v1125_v63, 1e-16  ;;  %v1144_v13 = vmax.f32 %v1122_v7, 1e-16 }
 0x798   :  { %1881 = vrsqrt.f32 %v1145_v6 }
 0x799   :  { %v1131_v40 = vpop.xlane.xlu1 %1130  ;;  %v1128_v38 = vpop.xlane.xlu0 %1127  ;;  %1883 = vrsqrt.f32 %v1144_v13 }
 0x79a   :  { %1885 = vrsqrt.f32 %v1098_v18  ;;  %v1146_v25 = vmax.f32 %v1128_v38, 1e-16  ;;  %v1147_v30 = vmax.f32 %v1131_v40, 1e-16 }
 0x79b   :  { %1887 = vrsqrt.f32 %v1099_v19 }
 0x79c   :  { %1889 = vrsqrt.f32 %v1100_v20 }
 0x79d   :  { %v1137_v10 = vpop.xlane.xlu1 %1136  ;;  %v1134_v59 = vpop.xlane.xlu0 %1133  ;;  %1891 = vrsqrt.f32 %v1101_v23 }
 0x79e   :  { %1893 = vrsqrt.f32 %v1146_v25  ;;  %v1148_v54 = vmax.f32 %v1134_v59, 1e-16  ;;  %v1149_v34 = vmax.f32 %v1137_v10, 1e-16 }
 0x79f   :  { %1895 = vrsqrt.f32 %v1147_v30 }
 0x7a0   :  { %1897 = vrsqrt.f32 %v1102_v0 }
 0x7a1   :  { %v1143_v15 = vpop.xlane.xlu1 %1142  ;;  %v1140_v16 = vpop.xlane.xlu0 %1139 }
 0x7a2   :  { %v1882_v33 = vpop.eup %1881  ;;  %v1150_v56 = vmax.f32 %v1140_v16, 1e-16  ;;  %v1151_v37 = vmax.f32 %v1143_v15, 1e-16 }
 0x7a3   :  { %v1884_v57 = vpop.eup %1883 }
 0x7a4   :  { %v1886_v42 = vpop.eup %1885 }
 0x7a5   :  { %v1173_v21 = vpop.xlane.xlu1 %1172  ;;  %v1170_v29 = vpop.xlane.xlu0 %1169 }
 0x7a6   :  { %v1193_v31 = vmul.f32 %v1878_v24, %v1173_v21  ;;  %v1192_v55 = vmul.f32 %v1880_v53, %v1170_v29  ;;  %v1888_v1 = vpop.eup %1887 }
 0x7a7   :  { %v1890_v8 = vpop.eup %1889 }
 0x7a8   :  { %v1201_v52 = vmul.f32 %v1882_v33, %v1193_v31  ;;  %v1200_v36 = vmul.f32 %v1884_v57, %v1192_v55  ;;  %v1892_v4 = vpop.eup %1891 }
 0x7a9   :  { %v1894_v3 = vpop.eup %1893 }
 0x7aa   :  { %v1208_v39 = vadd.f32 %v1201_v52, %v1200_v36  ;;  %v1896_v5 = vpop.eup %1895 }
 0x7ab   :  { %v1898_v17 = vpop.eup %1897 }
 0x7ac   :  { %v1209_v11 = vrot.slane %v1208_v39, 4 }
 0x7ae   :  { %v1210_v2 = vadd.f32 %v1209_v11, %v1208_v39 }
 0x7b0   :  { %v1211_v6 = vrot.slane %v1210_v2, 2 }
 0x7f3   :  { %v1453_v35 = vpop.xlane.xlu0 %1452 }
 0x7f4   :  { %1899 = vlog2.f32 %v1453_v35 }
 0x7f5   :  { %1901 = vrsqrt.f32 %v1148_v54 }
 0x7f6   :  { %1903 = vrsqrt.f32 %v1149_v34  ;;  %v1456_v41 = vpop.xlane.xlu1 %1455  ;;  %v1212_v34 = vadd.f32 %v1211_v6, %v1210_v2 }
 0x7f7   :  { %1905 = vlog2.f32 %v1456_v41  ;;  %v1176_v46 = vpop.xlane.xlu0 %1175 }
 0x7f8   :  { %1907 = vrsqrt.f32 %v1103_v62  ;;  %v1194_v44 = vmul.f32 %v1886_v42, %v1176_v46 }
 0x7f9   :  { %1909 = vrsqrt.f32 %v1150_v56 }
 0x7fa   :  { %1911 = vrsqrt.f32 %v1151_v37  ;;  %v1179_v43 = vpop.xlane.xlu1 %1178  ;;  %v1202_v47 = vmul.f32 %v1894_v3, %v1194_v44 }
 0x7fb   :  { %v1195_v14 = vmul.f32 %v1888_v1, %v1179_v43  ;;  %v1182_v45 = vpop.xlane.xlu0 %1181 }
 0x7fc   :  { %v1196_v32 = vmul.f32 %v1890_v8, %v1182_v45  ;;  %v1213_v8 = vrot.slane %v1212_v34, 1 }
 0x7fd   :  { %v1203_v26 = vmul.f32 %v1896_v5, %v1195_v14 }
 0x7fe   :  { %v1900_v27 = vpop.eup %1899  ;;  %v1185_v48 = vpop.xlane.xlu1 %1184 }
 0x7ff   :  { %v1902_v49 = vpop.eup %1901  ;;  %v1458_v51 = vmul.f32 0.6931472, %v1900_v27  ;;  %v1215_v58 = vadd.f32 %v1203_v26, %v1202_v47  ;;  %v1197_v60 = vmul.f32 %v1892_v4, %v1185_v48  ;;  %v1188_v61 = vpop.xlane.xlu0 %1187 }
 0x800   :  { %v1904_v63 = vpop.eup %1903  ;;  %v1198_v7 = vmul.f32 %v1898_v17, %v1188_v61  ;;  %v1204_v10 = vmul.f32 %v1902_v49, %v1196_v32 }
 0x801   :  { %v1906_v40 = vpop.eup %1905  ;;  %v1461_v38 = vadd.f32 %v1458_v51, %v2463_v22  ;;  %v1216_v9 = vrot.slane %v1215_v58, 4  ;;  %v1205_v12 = vmul.f32 %v1904_v63, %v1197_v60  ;;  %v1214_v51 = vadd.f32 %v1213_v8, %v1212_v34 }
 0x802   :  { %v1908_v59 = vpop.eup %1907  ;;  %v1460_v13 = vmul.f32 0.6931472, %v1906_v40  ;;  %v1191_v15 = vpop.xlane.xlu1 %1190 }
 0x803   :  { %v1910_v16 = vpop.eup %1909  ;;  %v1501_v18 = vrot.slane %v1461_v38, 4  ;;  %v1217_v19 = vadd.f32 %v1216_v9, %v1215_v58  ;;  %v1225_v20 = vadd.f32 %v1205_v12, %v1204_v10  ;;  %v1199_v21 = vmul.f32 %v1908_v59, %v1191_v15  ;;  %v1433_v23 = vpop.xlane.xlu0 %1432 }
 0x804   :  { %v1912_v24 = vpop.eup %1911  ;;  %v1462_v25 = vadd.f32 %v1460_v13, %v2467_v28  ;;  %v1206_v29 = vmul.f32 %v1910_v16, %v1198_v7  ;;  %v1437_v30 = vmul.f32 %v1433_v23, %v2384_v50  ;;  %v1223_v15 = vmul.f32 0.0625, %v1214_v51 }
 0x805   :  { %v1502_v22 = vadd.f32 %v1501_v18, %v1461_v38  ;;  %v1218_v31 = vrot.slane %v1217_v19, 2  ;;  %v1226_v53 = vrot.slane %v1225_v20, 4  ;;  %v1207_v0 = vmul.f32 %v1912_v24, %v1199_v21 }
 0x806   :  { %v1507_v55 = vrot.slane %v1462_v25, 4  ;;  %v1528_v33 = vrot.slane %v1437_v30, 4  ;;  %v1436_v54 = vpop.xlane.xlu1 %1435 }
 0x807   :  { %v1227_v52 = vadd.f32 %v1226_v53, %v1225_v20  ;;  %v1232_v57 = vadd.f32 %v1207_v0, %v1206_v29  ;;  %v1438_v35 = vmul.f32 %v1436_v54, %v2384_v50  ;;  %v1503_v56 = vrot.slane %v1502_v22, 2  ;;  %v1518_v47 = vpop.xlane.xlu0 %1517 }
 0x808   :  { %v1508_v62 = vadd.f32 %v1507_v55, %v1462_v25  ;;  %v1529_v36 = vadd.f32 %v1528_v33, %v1437_v30  ;;  %v1219_v37 = vadd.f32 %v1218_v31, %v1217_v19  ;;  %v1522_v63 = vmul.f32 0.125, %v1518_v47 }
 0x809   :  { %v1228_v28 = vrot.slane %v1227_v52, 2  ;;  %v1233_v39 = vrot.slane %v1232_v57, 4  ;;  %v1534_v41 = vrot.slane %v1438_v35, 4  ;;  %v1504_v46 = vadd.f32 %v1503_v56, %v1502_v22 }
 0x80a   :  { %v1530_v42 = vrot.slane %v1529_v36, 2  ;;  %v1509_v1 = vrot.slane %v1508_v62, 2  ;;  %v1220_v45 = vrot.slane %v1219_v37, 1  ;;  %v1521_v49 = vpop.xlane.xlu1 %1520 }
 0x80b   :  { %v1229_v44 = vadd.f32 %v1228_v28, %v1227_v52  ;;  %v1234_v4 = vadd.f32 %v1233_v39, %v1232_v57  ;;  %v1535_v11 = vadd.f32 %v1534_v41, %v1438_v35  ;;  %v1505_v3 = vrot.slane %v1504_v46, 1 }
 0x80c   :  { %v1531_v43 = vadd.f32 %v1530_v42, %v1529_v36  ;;  %v1510_v14 = vadd.f32 %v1509_v1, %v1508_v62  ;;  %v1221_v9 = vadd.f32 %v1220_v45, %v1219_v37  ;;  %v1523_v6 = vmul.f32 0.125, %v1521_v49 }
 0x80d   :  { %v1230_v5 = vrot.slane %v1229_v44, 1  ;;  %v1235_v50 = vrot.slane %v1234_v4, 2  ;;  %v1536_v17 = vrot.slane %v1535_v11, 2  ;;  %v1506_v32 = vadd.f32 %v1505_v3, %v1504_v46 }
 0x80e   :  { %v1532_v26 = vrot.slane %v1531_v43, 1  ;;  %v1511_v27 = vrot.slane %v1510_v14, 1  ;;  %v1224_v23 = vmul.f32 0.0625, %v1221_v9 }
 0x80f   :  { %v1236_v2 = vadd.f32 %v1235_v50, %v1234_v4  ;;  %v1537_v48 = vadd.f32 %v1536_v17, %v1535_v11  ;;  %v1231_v58 = vadd.f32 %v1230_v5, %v1229_v44  ;;  %v1514_v61 = vmul.f32 0.125, %v1506_v32 }
 0x810   :  { %v1533_v60 = vadd.f32 %v1532_v26, %v1531_v43  ;;  %v1512_v7 = vadd.f32 %v1511_v27, %v1510_v14 }
 0x811   :  { %v1237_v40 = vrot.slane %v1236_v2, 1  ;;  %v1538_v38 = vrot.slane %v1537_v48, 1  ;;  %v1239_v10 = vmul.f32 0.0625, %v1231_v58  ;;  %v1524_v12 = vadd.f32 %v1522_v63, %v1514_v61 }
 0x812   :  { %v1515_v59 = vmul.f32 0.125, %v1512_v7  ;;  %v1540_v18 = vmul.f32 0.125, %v1533_v60 }
 0x813   :  { %v1539_v13 = vadd.f32 %v1538_v38, %v1537_v48  ;;  %v1238_v16 = vadd.f32 %v1237_v40, %v1236_v2  ;;  %v1526_v19 = vmul.f32 0.5, %v1524_v12  ;;  %v1241_v25 = vadd.f32 %v1239_v10, %v1223_v15 }
 0x814   :  { %v1525_v20 = vadd.f32 %v1523_v6, %v1515_v59 }
 0x815   :  { %v1541_v21 = vmul.f32 0.125, %v1539_v13  ;;  %v1240_v24 = vmul.f32 0.0625, %v1238_v16  ;;  %v1542_v22 = vsub.f32 %v1526_v19, %v1540_v18  ;;  %v1243_v53 = vmul.f32 -0.5, %v1241_v25 }
 0x816   :  { %v1527_v29 = vmul.f32 0.5, %v1525_v20 }
 0x817   :  { %v1242_v30 = vadd.f32 %v1240_v24, %v1224_v23 }
 0x818   :  { %v1543_v31 = vsub.f32 %v1527_v29, %v1541_v21 }
 0x819   :  { %v1244_v0 = vmul.f32 -0.5, %v1242_v30 }
 0x81a   :  { %v1552_v55 = vsel %vm1546_vm5, %v1543_v31, %v1542_v22 }
 0x81b   :  { %v1547_v33 = vsel %vm1546_vm5, %v1244_v0, %v1243_v53  ;;  %1554 = vst [vmem:[#allocation14] sm:$0x3] %v1552_v55 }
 0x81c   :  { %1549 = vst [vmem:[#allocation12] sm:$0x3] %v1547_v33 }
 0x81d   :  { %2034 = shalt.err (!%p2031_p2)
}
 0x81e   :  { %s2035_s10 = scalar_lea.hbm %s2550_s8, 32 }
 0x81f   :  { %p2036_p3 = scmp.ne.s32.totalorder %s2550_s8, %s2035_s10  ;;  %p2039_p4 = scmp.lt.u32.totalorder %s2035_s10, %s2550_s8 }
 0x821   :  { %p2041_p5 = pnand %p2039_p4, %p2036_p3 }
 0x823   :  { %2044 = shalt.err (!%p2041_p5)
}
 0x824   :  { %1576 = dma.vmem_to_hbm [thread:$0]  %s1574_s21, 32, %s2550_s8, [#allocation13]  }
 0x825   :  { %s2045_s17 = scalar_lea.vmem %s1584_s30, 32  ;;  %p2050_p7 = scmp.lt.s32.totalorder %s1584_s30, %s1584_s30 }
 0x826   :  { %p2046_p6 = scmp.ne.s32.totalorder %s1584_s30, %s2045_s17  ;;  %p2051_p8 = scmp.lt.s32.totalorder %s2045_s17, %s2045_s17 }
 0x828   :  { %p2052_p9 = por %p2051_p8, %p2050_p7 }
 0x82a   :  { %p2053_p10 = pnand %p2052_p9, %p2046_p6 }
 0x82c   :  { %2056 = shalt.err (!%p2053_p10)
}
 0x82d   :  { %s2057_s0 = scalar_lea.hbm %s2551_s9, 32 }
 0x82e   :  { %p2058_p11 = scmp.ne.s32.totalorder %s2551_s9, %s2057_s0  ;;  %p2061_p12 = scmp.lt.u32.totalorder %s2057_s0, %s2551_s9 }
 0x830   :  { %p2063_p13 = pnand %p2061_p12, %p2058_p11 }
 0x832   :  { %2066 = shalt.err (!%p2063_p13)
}
 0x833   :  { %1586 = dma.vmem_to_hbm [thread:$0]  %s1584_s30, 32, %s2551_s9, [#allocation13]  }
 0x834   :  { %2073 = dma.done.wait [#allocation5], 512  }
 0x835   :  { %2074 = vsyncadd [#allocation5], 4294966784 }
 0x836   :  { %2075 = dma.done.wait [#allocation13], 64  }
 0x837   :  { %2076 = vsyncadd [#allocation13], 4294967232 }
 0x838   :  { %1596 = vsyncpa [#allocation4], 1 }
 0x839   :  { %1597 = vsyncpa [#allocation7], 1 }
 0x83a   :  { %1598 = vsyncpa [#allocation10], 1 }
 0x83b   :  { %1599 = vsyncpa [#allocation5], 1 }
 0x83c   :  { %1600 = vsyncpa [#allocation13], 1 }

</bundles_post_ra>
